<compile_context>
chip_gen: v6e
topology: v6e:2x2x1
jax: 0.10.0
libtpu: 0.0.40
codegen_flags: <defaults>
</compile_context>

<pallas_src>
import functools

import jax
import jax.numpy as jnp
from jax.experimental import pallas as pl
from jax.experimental.pallas import tpu as pltpu


# Tap order: t = (di+1)*3 + (dj+1), matching weight[..., ki, kj] with ki=di+1, kj=dj+1.
TAP_OFFSETS = tuple((di, dj) for di in (-1, 0, 1) for dj in (-1, 0, 1))


def _vmem_limit_bytes():
    # Generation-aware scoped VMEM: ~3/4 of physical, capped at 100 MiB
    # (v5e/v6e: 128 MiB physical -> 96/100 MiB; v7x: 64 MiB -> 48 MiB).
    try:
        cap = pltpu.get_tpu_info().vmem_capacity_bytes
        return min(int(cap * 3 // 4), 100 * 1024 * 1024)
    except Exception:
        return 32 * 1024 * 1024


# --------------------------------------------------------------------------
# Kernel 1: fused BlockUnpool (1x1 -> convT(2,2,s2) -> 1x1) as ONE batched MXU matmul
# producing a lane-dense polyphase layout:
#   poly[(oc*2+di)*2+dj, b*H*W + h*W + w] = sum_c W_up[k, c] * x[c, b, h, w] + B_up[k]
# --------------------------------------------------------------------------
def unpool_kernel(w_ref, x_ref, b_ref, o_ref):
    o_ref[...] = jnp.dot(w_ref[...], x_ref[...],
                         preferred_element_type=jnp.float32) + b_ref[...]


# --------------------------------------------------------------------------
# Kernel 2: fused head.  Per image (lane-dense (C, N) tiles, N = HH*WW):
#   bridge = affine_BN(LeakyReLU(conv3x3(skip) + b))
#   y1     = hswish(conv3x3([up, bridge]) + b1)          (BN folded into weights)
#   out    = hswish(conv3x3(y1) + b2  +  conv1x1([up, bridge]) + bsc)
# Every 3x3 conv = 9 MXU tap-matmuls; padding = lane roll (XLU) + border mask.
# --------------------------------------------------------------------------
def head_kernel(up_ref, sk_ref, mask_ref,
                wbr_ref, bbr_ref, sbr_ref, tbr_ref,
                w1u_ref, w1b_ref, b1_ref,
                w2_ref, b2_ref,
                wscu_ref, wscb_ref, bsc_ref,
                out_ref, *, ww):
    n = out_ref.shape[2]
    up = up_ref[0]                     # (C, N) lane-dense
    sk = sk_ref[0]                     # (C, N)

    def conv3x3(x, w_taps_ref):
        c_out = w_taps_ref.shape[1]
        acc = jnp.zeros((c_out, n), jnp.float32)
        for t, (di, dj) in enumerate(TAP_OFFSETS):
            off = di * ww + dj
            if off == 0:
                tap_in = x
            else:
                # circular lane shift (XLU) + per-tap border mask == zero padding
                tap_in = pltpu.roll(x, (-off) % n, 1) * mask_ref[t]
            acc = acc + jnp.dot(w_taps_ref[t], tap_in,
                                preferred_element_type=jnp.float32)
        return acc

    # ---- BlockBridge: conv3x3(+bias) -> LeakyReLU(0.01) -> BN (eval affine) ----
    a = conv3x3(sk, wbr_ref) + bbr_ref[...]
    a = jnp.where(a >= 0.0, a, 0.01 * a)
    bridge = sbr_ref[...] * a + tbr_ref[...]

    # ---- BottleNeck.conv1 on cat=[up, bridge] (BN folded) -> hard-swish ----
    # (channel concat avoided by splitting the weight into up/bridge halves)
    y1 = conv3x3(up, w1u_ref) + conv3x3(bridge, w1b_ref) + b1_ref[...]
    y1 = y1 * jnp.clip(y1 + 3.0, 0.0, 6.0) * (1.0 / 6.0)

    # ---- conv2 (BN folded) + 1x1 shortcut (BN folded) -> add -> hard-swish ----
    y2 = conv3x3(y1, w2_ref) + b2_ref[...]
    sc = (jnp.dot(wscu_ref[...], up, preferred_element_type=jnp.float32)
          + jnp.dot(wscb_ref[...], bridge, preferred_element_type=jnp.float32)
          + bsc_ref[...])
    z = y2 + sc
    out_ref[0] = z * jnp.clip(z + 3.0, 0.0, 6.0) * (1.0 / 6.0)


# --------------------------------------------------------------------------
# Wrapper: parameter folding + two pallas_calls.
# --------------------------------------------------------------------------
_HI = jax.lax.Precision.HIGHEST


def _bn_fold(p, eps):
    s = p["gamma"] / jnp.sqrt(p["var"] + eps)
    return s, p["beta"] - p["mean"] * s


def _conv_taps(w):
    # (C_out, C_in, 3, 3) -> (9, C_out, C_in), tap order matches TAP_OFFSETS.
    return jnp.transpose(w, (2, 3, 0, 1)).reshape(9, w.shape[0], w.shape[1])


def _tap_masks(hh, ww):
    # mask[t, 0, h*WW+w] = 1 iff (h+di, w+dj) is inside the image for tap t.
    hs = jnp.arange(hh)
    ws = jnp.arange(ww)
    rows = []
    for di, dj in TAP_OFFSETS:
        hv = ((hs + di >= 0) & (hs + di < hh)).astype(jnp.float32)
        wv = ((ws + dj >= 0) & (ws + dj < ww)).astype(jnp.float32)
        rows.append((hv[:, None] * wv[None, :]).reshape(1, hh * ww))
    return jnp.stack(rows, axis=0)                         # (9, 1, HH*WW)


def block_upsample_forward(x, skip, params, eps=1e-5):
    B, in_c, H, W = x.shape
    Bs, out_c, HH, WW = skip.shape
    assert Bs == B and HH == 2 * H and WW == 2 * W
    N = HH * WW
    vmem_limit = _vmem_limit_bytes()

    # ---- fold BlockUnpool (1x1 -> convT(2,2,s2) -> 1x1) into one linear map ----
    wA = params["up_c1_w"][:, :, 0, 0]          # (in_c, in_c)   [out, in]
    bA = params["up_c1_b"]
    wT = params["up_tc_w"]                      # (in_c, out_c, 2, 2)
    bT = params["up_tc_b"]
    wC = params["up_c2_w"][:, :, 0, 0]          # (out_c, out_c) [out, in]
    bC = params["up_c2_b"]
    wEff = jnp.einsum("imde,om->iode", wT, wC, precision=_HI)       # (in_c, out_c, 2, 2)
    W_up = jnp.einsum("ic,iode->odec", wA, wEff, precision=_HI
                      ).reshape(4 * out_c, in_c)
    B_up = (jnp.einsum("i,iode->ode", bA, wEff, precision=_HI)
            + (wC @ bT)[:, None, None] + bC[:, None, None]).reshape(4 * out_c, 1)

    # ---- Kernel 1: ONE batched unpool matmul (lane dim = B*H*W, no per-image grid) ----
    x2d = x.transpose(1, 0, 2, 3).reshape(in_c, B * H * W)
    vm = pl.BlockSpec(memory_space=pltpu.MemorySpace.VMEM)
    poly = pl.pallas_call(
        unpool_kernel,
        out_shape=jax.ShapeDtypeStruct((4 * out_c, B * H * W), jnp.float32),
        in_specs=[vm, vm, vm],
        out_specs=vm,
        compiler_params=pltpu.CompilerParams(vmem_limit_bytes=vmem_limit),
    )(W_up, x2d, B_up)

    # polyphase -> spatial interleave (cheap XLA transpose; no jnp.pad round-trips)
    up_flat = (poly.reshape(out_c, 2, 2, B, H, W)
                   .transpose(3, 0, 4, 1, 5, 2)
                   .reshape(B, out_c, N))
    skip_flat = skip.reshape(B, out_c, N)

    # ---- fold eval-mode BatchNorms; repack conv weights tap-major for the MXU ----
    sbr, tbr = _bn_fold(params["br_bn"], eps)      # bridge BN (after LeakyReLU)
    s1, t1 = _bn_fold(params["c1_bn"], eps)
    s2, t2 = _bn_fold(params["c2_bn"], eps)
    ssc, tsc = _bn_fold(params["sc_bn"], eps)

    wbr_taps = _conv_taps(params["br_w"])                            # (9, C, C)
    w1e = params["c1_w"] * s1[:, None, None, None]                   # (C, 2C, 3, 3)
    w1u_taps = _conv_taps(w1e[:, :out_c])                            # up half
    w1b_taps = _conv_taps(w1e[:, out_c:])                            # bridge half
    w2_taps = _conv_taps(params["c2_w"] * s2[:, None, None, None])
    wsce = params["sc_w"][:, :, 0, 0] * ssc[:, None]                 # (C, 2C)
    wscu, wscb = wsce[:, :out_c], wsce[:, out_c:]

    masks = _tap_masks(HH, WW)                                       # (9, 1, N)
    col = lambda v: v.reshape(out_c, 1).astype(jnp.float32)

    feat_spec = pl.BlockSpec((1, out_c, N), lambda b: (b, 0, 0))

    def cspec(shape):
        nd = len(shape)
        return pl.BlockSpec(shape, lambda b: (0,) * nd)

    out_flat = pl.pallas_call(
        functools.partial(head_kernel, ww=WW),
        out_shape=jax.ShapeDtypeStruct((B, out_c, N), jnp.float32),
        grid=(B,),
        in_specs=[feat_spec, feat_spec,
                  cspec((9, 1, N)),
                  cspec((9, out_c, out_c)), cspec((out_c, 1)),
                  cspec((out_c, 1)), cspec((out_c, 1)),
                  cspec((9, out_c, out_c)), cspec((9, out_c, out_c)), cspec((out_c, 1)),
                  cspec((9, out_c, out_c)), cspec((out_c, 1)),
                  cspec((out_c, out_c)), cspec((out_c, out_c)), cspec((out_c, 1))],
        out_specs=pl.BlockSpec((1, out_c, N), lambda b: (b, 0, 0)),
        compiler_params=pltpu.CompilerParams(
            dimension_semantics=("parallel",),
            vmem_limit_bytes=vmem_limit),
    )(up_flat, skip_flat, masks,
      wbr_taps, col(params["br_b"]), col(sbr), col(tbr),
      w1u_taps, w1b_taps, col(t1),
      w2_taps, col(t2),
      wscu, wscb, col(tsc))

    return out_flat.reshape(B, out_c, HH, WW)


# --------------------------------------------------------------------------
# Pure-JAX reference (numerical self-check).
# --------------------------------------------------------------------------
def _reference_forward(x, skip, params, eps=1e-5):
    def conv(z, w, b=None, pad=0):
        y = jax.lax.conv_general_dilated(
            z, w, window_strides=(1, 1), padding=[(pad, pad), (pad, pad)],
            dimension_numbers=("NCHW", "OIHW", "NCHW"), precision=_HI)
        return y if b is None else y + b[None, :, None, None]

    def bn(z, p):
        s = p["gamma"] / jnp.sqrt(p["var"] + eps)
        return (z - p["mean"][None, :, None, None]) * s[None, :, None, None] \
            + p["beta"][None, :, None, None]

    def hswish(z):
        return z * jnp.clip(z + 3.0, 0.0, 6.0) / 6.0

    B, _, H, W = x.shape
    out_c = params["up_tc_w"].shape[1]
    a = conv(x, params["up_c1_w"], params["up_c1_b"])
    t = jnp.einsum("bihw,iode->bohdwe", a, params["up_tc_w"], precision=_HI)
    t = t.reshape(B, out_c, 2 * H, 2 * W) + params["up_tc_b"][None, :, None, None]
    up = conv(t, params["up_c2_w"], params["up_c2_b"])

    d = conv(skip, params["br_w"], params["br_b"], pad=1)
    d = jnp.where(d >= 0.0, d, 0.01 * d)
    bridge = bn(d, params["br_bn"])

    cat = jnp.concatenate([up, bridge], axis=1)
    y1 = hswish(bn(conv(cat, params["c1_w"], None, pad=1), params["c1_bn"]))
    y2 = bn(conv(y1, params["c2_w"], None, pad=1), params["c2_bn"])
    sc = bn(conv(cat, params["sc_w"], None, pad=0), params["sc_bn"])
    return hswish(y2 + sc)


if __name__ == "__main__":
    B, in_c, out_c, H, W = 2, 8, 4, 8, 8
    key = jax.random.PRNGKey(0)
    keys = jax.random.split(key, 20)

    def nrm(k, shape, scale=0.1):
        return scale * jax.random.normal(k, shape, jnp.float32)

    def bn_params(k):
        k1, k2, k3, k4 = jax.random.split(k, 4)
        return {"gamma": jax.random.uniform(k1, (out_c,), jnp.float32, 0.5, 1.5),
                "beta": nrm(k2, (out_c,)),
                "mean": nrm(k3, (out_c,)),
                "var": jax.random.uniform(k4, (out_c,), jnp.float32, 0.5, 1.5)}

    x = jax.random.normal(keys[0], (B, in_c, H, W), jnp.float32)
    skip = jax.random.normal(keys[1], (B, out_c, 2 * H, 2 * W), jnp.float32)
    params = {
        "up_c1_w": nrm(keys[2], (in_c, in_c, 1, 1)), "up_c1_b": nrm(keys[3], (in_c,)),
        "up_tc_w": nrm(keys[4], (in_c, out_c, 2, 2)), "up_tc_b": nrm(keys[5], (out_c,)),
        "up_c2_w": nrm(keys[6], (out_c, out_c, 1, 1)), "up_c2_b": nrm(keys[7], (out_c,)),
        "br_w": nrm(keys[8], (out_c, out_c, 3, 3)), "br_b": nrm(keys[9], (out_c,)),
        "br_bn": bn_params(keys[10]),
        "c1_w": nrm(keys[11], (out_c, 2 * out_c, 3, 3)), "c1_bn": bn_params(keys[12]),
        "c2_w": nrm(keys[13], (out_c, out_c, 3, 3)), "c2_bn": bn_params(keys[14]),
        "sc_w": nrm(keys[15], (out_c, 2 * out_c, 1, 1)), "sc_bn": bn_params(keys[16]),
    }

    fwd = jax.jit(block_upsample_forward)
    y = fwd(x, skip, params)
    jax.block_until_ready(y)
    assert y.shape == (B, out_c, 2 * H, 2 * W)

    y_ref = _reference_forward(x, skip, params)
    err = float(jnp.max(jnp.abs(y - y_ref)))
    assert err < 5e-3, f"mismatch vs pure-JAX reference: {err}"
    print("KERNEL_OK")
</pallas_src>

<mosaic_0001>
module attributes {stable_mosaic.version = 11 : i64} {
  func.func @unpool_kernel(%arg0: memref<16x8xf32, #tpu.memory_space<vmem>>, %arg1: memref<8x128xf32, #tpu.memory_space<vmem>>, %arg2: memref<16x1xf32, #tpu.memory_space<vmem>>, %arg3: memref<16x128xf32, #tpu.memory_space<vmem>>) attributes {dimension_semantics = [], scalar_prefetch = 0 : i64, scratch_operands = 0 : i64, tpu.core_type = #tpu.core_type<tc>} {
    %c0 = arith.constant 0 : index
    %c0_0 = arith.constant 0 : index
    %0 = vector.load %arg0[%c0, %c0_0] : memref<16x8xf32, #tpu.memory_space<vmem>>, vector<16x8xf32>
    %c0_1 = arith.constant 0 : index
    %c0_2 = arith.constant 0 : index
    %1 = vector.load %arg1[%c0_1, %c0_2] : memref<8x128xf32, #tpu.memory_space<vmem>>, vector<8x128xf32>
    %cst = arith.constant dense<0.000000e+00> : vector<16x128xf32>
    %2 = tpu.matmul %0, %1, %cst {dimension_numbers = #tpu.dot_dimension_numbers<[1], [0], [0], [1], [0, 0, 1, 1], [], []>} : vector<16x8xf32>, vector<8x128xf32>, vector<16x128xf32> -> vector<16x128xf32>
    %c0_3 = arith.constant 0 : index
    %c0_4 = arith.constant 0 : index
    %3 = vector.load %arg2[%c0_3, %c0_4] : memref<16x1xf32, #tpu.memory_space<vmem>>, vector<16x1xf32>
    %4 = vector.broadcast %3 : vector<16x1xf32> to vector<16x128xf32>
    %5 = arith.addf %2, %4 : vector<16x128xf32>
    %c0_5 = arith.constant 0 : index
    %c0_6 = arith.constant 0 : index
    %6 = vector.load %arg3[%c0_5, %c0_6] : memref<16x128xf32, #tpu.memory_space<vmem>>, vector<16x128xf32>
    tpu.vector_store %arg3[%c0_5, %c0_6], %5 {strides = array<i32>} : memref<16x128xf32, #tpu.memory_space<vmem>>, vector<16x128xf32>,
    return
  }
}

module attributes {stable_mosaic.version = 11 : i64} {
  func.func @head_kernel(%arg0: i32, %arg1: memref<1x4x256xf32, #tpu.memory_space<vmem>>, %arg2: memref<1x4x256xf32, #tpu.memory_space<vmem>>, %arg3: memref<9x1x256xf32, #tpu.memory_space<vmem>>, %arg4: memref<9x4x4xf32, #tpu.memory_space<vmem>>, %arg5: memref<4x1xf32, #tpu.memory_space<vmem>>, %arg6: memref<4x1xf32, #tpu.memory_space<vmem>>, %arg7: memref<4x1xf32, #tpu.memory_space<vmem>>, %arg8: memref<9x4x4xf32, #tpu.memory_space<vmem>>, %arg9: memref<9x4x4xf32, #tpu.memory_space<vmem>>, %arg10: memref<4x1xf32, #tpu.memory_space<vmem>>, %arg11: memref<9x4x4xf32, #tpu.memory_space<vmem>>, %arg12: memref<4x1xf32, #tpu.memory_space<vmem>>, %arg13: memref<4x4xf32, #tpu.memory_space<vmem>>, %arg14: memref<4x4xf32, #tpu.memory_space<vmem>>, %arg15: memref<4x1xf32, #tpu.memory_space<vmem>>, %arg16: memref<1x4x256xf32, #tpu.memory_space<vmem>>) attributes {dimension_semantics = [#tpu.dimension_semantics<parallel>], iteration_bounds = array<i64: 2>, scalar_prefetch = 0 : i64, scratch_operands = 0 : i64, tpu.core_type = #tpu.core_type<tc>, window_params = [{transform_indices = @transform_0, window_bounds = array<i64: 1, 4, 256>}, {transform_indices = @transform_1, window_bounds = array<i64: 1, 4, 256>}, {pipeline_mode = #tpu.pipeline_mode<synchronous>, transform_indices = @transform_2, window_bounds = array<i64: 9, 1, 256>}, {pipeline_mode = #tpu.pipeline_mode<synchronous>, transform_indices = @transform_3, window_bounds = array<i64: 9, 4, 4>}, {pipeline_mode = #tpu.pipeline_mode<synchronous>, transform_indices = @transform_4, window_bounds = array<i64: 4, 1>}, {pipeline_mode = #tpu.pipeline_mode<synchronous>, transform_indices = @transform_5, window_bounds = array<i64: 4, 1>}, {pipeline_mode = #tpu.pipeline_mode<synchronous>, transform_indices = @transform_6, window_bounds = array<i64: 4, 1>}, {pipeline_mode = #tpu.pipeline_mode<synchronous>, transform_indices = @transform_7, window_bounds = array<i64: 9, 4, 4>}, {pipeline_mode = #tpu.pipeline_mode<synchronous>, transform_indices = @transform_8, window_bounds = array<i64: 9, 4, 4>}, {pipeline_mode = #tpu.pipeline_mode<synchronous>, transform_indices = @transform_9, window_bounds = array<i64: 4, 1>}, {pipeline_mode = #tpu.pipeline_mode<synchronous>, transform_indices = @transform_10, window_bounds = array<i64: 9, 4, 4>}, {pipeline_mode = #tpu.pipeline_mode<synchronous>, transform_indices = @transform_11, window_bounds = array<i64: 4, 1>}, {pipeline_mode = #tpu.pipeline_mode<synchronous>, transform_indices = @transform_12, window_bounds = array<i64: 4, 4>}, {pipeline_mode = #tpu.pipeline_mode<synchronous>, transform_indices = @transform_13, window_bounds = array<i64: 4, 4>}, {pipeline_mode = #tpu.pipeline_mode<synchronous>, transform_indices = @transform_14, window_bounds = array<i64: 4, 1>}, {transform_indices = @transform_15, window_bounds = array<i64: 1, 4, 256>}]} {
    %c0 = arith.constant 0 : index
    %c0_0 = arith.constant 0 : index
    %c0_1 = arith.constant 0 : index
    %0 = vector.load %arg1[%c0, %c0_0, %c0_1] : memref<1x4x256xf32, #tpu.memory_space<vmem>>, vector<1x4x256xf32>
    %1 = vector.shape_cast %0 : vector<1x4x256xf32> to vector<4x256xf32>
    %c0_2 = arith.constant 0 : index
    %c0_3 = arith.constant 0 : index
    %c0_4 = arith.constant 0 : index
    %2 = vector.load %arg2[%c0_2, %c0_3, %c0_4] : memref<1x4x256xf32, #tpu.memory_space<vmem>>, vector<1x4x256xf32>
    %3 = vector.shape_cast %2 : vector<1x4x256xf32> to vector<4x256xf32>
    %cst = arith.constant 0.000000e+00 : f32
    %4 = vector.broadcast %cst : f32 to vector<4x256xf32>
    %c17_i32 = arith.constant 17 : i32
    %5 = tpu.dynamic_rotate %3 by %c17_i32 dim 1 : vector<4x256xf32>, i32 -> vector<4x256xf32>
    %c0_5 = arith.constant 0 : index
    %c0_6 = arith.constant 0 : index
    %c0_7 = arith.constant 0 : index
    %6 = vector.load %arg3[%c0_5, %c0_6, %c0_7] : memref<9x1x256xf32, #tpu.memory_space<vmem>>, vector<1x1x256xf32>
    %7 = vector.shape_cast %6 : vector<1x1x256xf32> to vector<1x256xf32>
    %8 = vector.broadcast %7 : vector<1x256xf32> to vector<4x256xf32>
    %9 = arith.mulf %5, %8 : vector<4x256xf32>
    %c0_8 = arith.constant 0 : index
    %c0_9 = arith.constant 0 : index
    %c0_10 = arith.constant 0 : index
    %10 = vector.load %arg4[%c0_8, %c0_9, %c0_10] : memref<9x4x4xf32, #tpu.memory_space<vmem>>, vector<1x4x4xf32>
    %11 = vector.shape_cast %10 : vector<1x4x4xf32> to vector<4x4xf32>
    %cst_11 = arith.constant dense<0.000000e+00> : vector<4x256xf32>
    %12 = tpu.matmul %11, %9, %cst_11 {dimension_numbers = #tpu.dot_dimension_numbers<[1], [0], [0], [1], [0, 0, 1, 1], [], []>} : vector<4x4xf32>, vector<4x256xf32>, vector<4x256xf32> -> vector<4x256xf32>
    %13 = arith.addf %4, %12 : vector<4x256xf32>
    %c16_i32 = arith.constant 16 : i32
    %14 = tpu.dynamic_rotate %3 by %c16_i32 dim 1 : vector<4x256xf32>, i32 -> vector<4x256xf32>
    %c1 = arith.constant 1 : index
    %c0_12 = arith.constant 0 : index
    %c0_13 = arith.constant 0 : index
    %15 = vector.load %arg3[%c1, %c0_12, %c0_13] : memref<9x1x256xf32, #tpu.memory_space<vmem>>, vector<1x1x256xf32>
    %16 = vector.shape_cast %15 : vector<1x1x256xf32> to vector<1x256xf32>
    %17 = vector.broadcast %16 : vector<1x256xf32> to vector<4x256xf32>
    %18 = arith.mulf %14, %17 : vector<4x256xf32>
    %c1_14 = arith.constant 1 : index
    %c0_15 = arith.constant 0 : index
    %c0_16 = arith.constant 0 : index
    %19 = vector.load %arg4[%c1_14, %c0_15, %c0_16] : memref<9x4x4xf32, #tpu.memory_space<vmem>>, vector<1x4x4xf32>
    %20 = vector.shape_cast %19 : vector<1x4x4xf32> to vector<4x4xf32>
    %cst_17 = arith.constant dense<0.000000e+00> : vector<4x256xf32>
    %21 = tpu.matmul %20, %18, %cst_17 {dimension_numbers = #tpu.dot_dimension_numbers<[1], [0], [0], [1], [0, 0, 1, 1], [], []>} : vector<4x4xf32>, vector<4x256xf32>, vector<4x256xf32> -> vector<4x256xf32>
    %22 = arith.addf %13, %21 : vector<4x256xf32>
    %c15_i32 = arith.constant 15 : i32
    %23 = tpu.dynamic_rotate %3 by %c15_i32 dim 1 : vector<4x256xf32>, i32 -> vector<4x256xf32>
    %c2 = arith.constant 2 : index
    %c0_18 = arith.constant 0 : index
    %c0_19 = arith.constant 0 : index
    %24 = vector.load %arg3[%c2, %c0_18, %c0_19] : memref<9x1x256xf32, #tpu.memory_space<vmem>>, vector<1x1x256xf32>
    %25 = vector.shape_cast %24 : vector<1x1x256xf32> to vector<1x256xf32>
    %26 = vector.broadcast %25 : vector<1x256xf32> to vector<4x256xf32>
    %27 = arith.mulf %23, %26 : vector<4x256xf32>
    %c2_20 = arith.constant 2 : index
    %c0_21 = arith.constant 0 : index
    %c0_22 = arith.constant 0 : index
    %28 = vector.load %arg4[%c2_20, %c0_21, %c0_22] : memref<9x4x4xf32, #tpu.memory_space<vmem>>, vector<1x4x4xf32>
    %29 = vector.shape_cast %28 : vector<1x4x4xf32> to vector<4x4xf32>
    %cst_23 = arith.constant dense<0.000000e+00> : vector<4x256xf32>
    %30 = tpu.matmul %29, %27, %cst_23 {dimension_numbers = #tpu.dot_dimension_numbers<[1], [0], [0], [1], [0, 0, 1, 1], [], []>} : vector<4x4xf32>, vector<4x256xf32>, vector<4x256xf32> -> vector<4x256xf32>
    %31 = arith.addf %22, %30 : vector<4x256xf32>
    %c1_i32 = arith.constant 1 : i32
    %32 = tpu.dynamic_rotate %3 by %c1_i32 dim 1 : vector<4x256xf32>, i32 -> vector<4x256xf32>
    %c3 = arith.constant 3 : index
    %c0_24 = arith.constant 0 : index
    %c0_25 = arith.constant 0 : index
    %33 = vector.load %arg3[%c3, %c0_24, %c0_25] : memref<9x1x256xf32, #tpu.memory_space<vmem>>, vector<1x1x256xf32>
    %34 = vector.shape_cast %33 : vector<1x1x256xf32> to vector<1x256xf32>
    %35 = vector.broadcast %34 : vector<1x256xf32> to vector<4x256xf32>
    %36 = arith.mulf %32, %35 : vector<4x256xf32>
    %c3_26 = arith.constant 3 : index
    %c0_27 = arith.constant 0 : index
    %c0_28 = arith.constant 0 : index
    %37 = vector.load %arg4[%c3_26, %c0_27, %c0_28] : memref<9x4x4xf32, #tpu.memory_space<vmem>>, vector<1x4x4xf32>
    %38 = vector.shape_cast %37 : vector<1x4x4xf32> to vector<4x4xf32>
    %cst_29 = arith.constant dense<0.000000e+00> : vector<4x256xf32>
    %39 = tpu.matmul %38, %36, %cst_29 {dimension_numbers = #tpu.dot_dimension_numbers<[1], [0], [0], [1], [0, 0, 1, 1], [], []>} : vector<4x4xf32>, vector<4x256xf32>, vector<4x256xf32> -> vector<4x256xf32>
    %40 = arith.addf %31, %39 : vector<4x256xf32>
    %c4 = arith.constant 4 : index
    %c0_30 = arith.constant 0 : index
    %c0_31 = arith.constant 0 : index
    %41 = vector.load %arg4[%c4, %c0_30, %c0_31] : memref<9x4x4xf32, #tpu.memory_space<vmem>>, vector<1x4x4xf32>
    %42 = vector.shape_cast %41 : vector<1x4x4xf32> to vector<4x4xf32>
    %cst_32 = arith.constant dense<0.000000e+00> : vector<4x256xf32>
    %43 = tpu.matmul %42, %3, %cst_32 {dimension_numbers = #tpu.dot_dimension_numbers<[1], [0], [0], [1], [0, 0, 1, 1], [], []>} : vector<4x4xf32>, vector<4x256xf32>, vector<4x256xf32> -> vector<4x256xf32>
    %44 = arith.addf %40, %43 : vector<4x256xf32>
    %c255_i32 = arith.constant 255 : i32
    %45 = tpu.dynamic_rotate %3 by %c255_i32 dim 1 : vector<4x256xf32>, i32 -> vector<4x256xf32>
    %c5 = arith.constant 5 : index
    %c0_33 = arith.constant 0 : index
    %c0_34 = arith.constant 0 : index
    %46 = vector.load %arg3[%c5, %c0_33, %c0_34] : memref<9x1x256xf32, #tpu.memory_space<vmem>>, vector<1x1x256xf32>
    %47 = vector.shape_cast %46 : vector<1x1x256xf32> to vector<1x256xf32>
    %48 = vector.broadcast %47 : vector<1x256xf32> to vector<4x256xf32>
    %49 = arith.mulf %45, %48 : vector<4x256xf32>
    %c5_35 = arith.constant 5 : index
    %c0_36 = arith.constant 0 : index
    %c0_37 = arith.constant 0 : index
    %50 = vector.load %arg4[%c5_35, %c0_36, %c0_37] : memref<9x4x4xf32, #tpu.memory_space<vmem>>, vector<1x4x4xf32>
    %51 = vector.shape_cast %50 : vector<1x4x4xf32> to vector<4x4xf32>
    %cst_38 = arith.constant dense<0.000000e+00> : vector<4x256xf32>
    %52 = tpu.matmul %51, %49, %cst_38 {dimension_numbers = #tpu.dot_dimension_numbers<[1], [0], [0], [1], [0, 0, 1, 1], [], []>} : vector<4x4xf32>, vector<4x256xf32>, vector<4x256xf32> -> vector<4x256xf32>
    %53 = arith.addf %44, %52 : vector<4x256xf32>
    %c241_i32 = arith.constant 241 : i32
    %54 = tpu.dynamic_rotate %3 by %c241_i32 dim 1 : vector<4x256xf32>, i32 -> vector<4x256xf32>
    %c6 = arith.constant 6 : index
    %c0_39 = arith.constant 0 : index
    %c0_40 = arith.constant 0 : index
    %55 = vector.load %arg3[%c6, %c0_39, %c0_40] : memref<9x1x256xf32, #tpu.memory_space<vmem>>, vector<1x1x256xf32>
    %56 = vector.shape_cast %55 : vector<1x1x256xf32> to vector<1x256xf32>
    %57 = vector.broadcast %56 : vector<1x256xf32> to vector<4x256xf32>
    %58 = arith.mulf %54, %57 : vector<4x256xf32>
    %c6_41 = arith.constant 6 : index
    %c0_42 = arith.constant 0 : index
    %c0_43 = arith.constant 0 : index
    %59 = vector.load %arg4[%c6_41, %c0_42, %c0_43] : memref<9x4x4xf32, #tpu.memory_space<vmem>>, vector<1x4x4xf32>
    %60 = vector.shape_cast %59 : vector<1x4x4xf32> to vector<4x4xf32>
    %cst_44 = arith.constant dense<0.000000e+00> : vector<4x256xf32>
    %61 = tpu.matmul %60, %58, %cst_44 {dimension_numbers = #tpu.dot_dimension_numbers<[1], [0], [0], [1], [0, 0, 1, 1], [], []>} : vector<4x4xf32>, vector<4x256xf32>, vector<4x256xf32> -> vector<4x256xf32>
    %62 = arith.addf %53, %61 : vector<4x256xf32>
    %c240_i32 = arith.constant 240 : i32
    %63 = tpu.dynamic_rotate %3 by %c240_i32 dim 1 : vector<4x256xf32>, i32 -> vector<4x256xf32>
    %c7 = arith.constant 7 : index
    %c0_45 = arith.constant 0 : index
    %c0_46 = arith.constant 0 : index
    %64 = vector.load %arg3[%c7, %c0_45, %c0_46] : memref<9x1x256xf32, #tpu.memory_space<vmem>>, vector<1x1x256xf32>
    %65 = vector.shape_cast %64 : vector<1x1x256xf32> to vector<1x256xf32>
    %66 = vector.broadcast %65 : vector<1x256xf32> to vector<4x256xf32>
    %67 = arith.mulf %63, %66 : vector<4x256xf32>
    %c7_47 = arith.constant 7 : index
    %c0_48 = arith.constant 0 : index
    %c0_49 = arith.constant 0 : index
    %68 = vector.load %arg4[%c7_47, %c0_48, %c0_49] : memref<9x4x4xf32, #tpu.memory_space<vmem>>, vector<1x4x4xf32>
    %69 = vector.shape_cast %68 : vector<1x4x4xf32> to vector<4x4xf32>
    %cst_50 = arith.constant dense<0.000000e+00> : vector<4x256xf32>
    %70 = tpu.matmul %69, %67, %cst_50 {dimension_numbers = #tpu.dot_dimension_numbers<[1], [0], [0], [1], [0, 0, 1, 1], [], []>} : vector<4x4xf32>, vector<4x256xf32>, vector<4x256xf32> -> vector<4x256xf32>
    %71 = arith.addf %62, %70 : vector<4x256xf32>
    %c239_i32 = arith.constant 239 : i32
    %72 = tpu.dynamic_rotate %3 by %c239_i32 dim 1 : vector<4x256xf32>, i32 -> vector<4x256xf32>
    %c8 = arith.constant 8 : index
    %c0_51 = arith.constant 0 : index
    %c0_52 = arith.constant 0 : index
    %73 = vector.load %arg3[%c8, %c0_51, %c0_52] : memref<9x1x256xf32, #tpu.memory_space<vmem>>, vector<1x1x256xf32>
    %74 = vector.shape_cast %73 : vector<1x1x256xf32> to vector<1x256xf32>
    %75 = vector.broadcast %74 : vector<1x256xf32> to vector<4x256xf32>
    %76 = arith.mulf %72, %75 : vector<4x256xf32>
    %c8_53 = arith.constant 8 : index
    %c0_54 = arith.constant 0 : index
    %c0_55 = arith.constant 0 : index
    %77 = vector.load %arg4[%c8_53, %c0_54, %c0_55] : memref<9x4x4xf32, #tpu.memory_space<vmem>>, vector<1x4x4xf32>
    %78 = vector.shape_cast %77 : vector<1x4x4xf32> to vector<4x4xf32>
    %cst_56 = arith.constant dense<0.000000e+00> : vector<4x256xf32>
    %79 = tpu.matmul %78, %76, %cst_56 {dimension_numbers = #tpu.dot_dimension_numbers<[1], [0], [0], [1], [0, 0, 1, 1], [], []>} : vector<4x4xf32>, vector<4x256xf32>, vector<4x256xf32> -> vector<4x256xf32>
    %80 = arith.addf %71, %79 : vector<4x256xf32>
    %c0_57 = arith.constant 0 : index
    %c0_58 = arith.constant 0 : index
    %81 = vector.load %arg5[%c0_57, %c0_58] : memref<4x1xf32, #tpu.memory_space<vmem>>, vector<4x1xf32>
    %82 = vector.broadcast %81 : vector<4x1xf32> to vector<4x256xf32>
    %83 = arith.addf %80, %82 : vector<4x256xf32>
    %cst_59 = arith.constant 0.000000e+00 : f32
    %84 = vector.broadcast %cst_59 : f32 to vector<4x256xf32>
    %85 = arith.cmpf oge, %83, %84 : vector<4x256xf32>
    %cst_60 = arith.constant 0.00999999977 : f32
    %86 = vector.broadcast %cst_60 : f32 to vector<4x256xf32>
    %87 = arith.mulf %86, %83 : vector<4x256xf32>
    %88 = arith.select %85, %83, %87 : vector<4x256xi1>, vector<4x256xf32>
    %c0_61 = arith.constant 0 : index
    %c0_62 = arith.constant 0 : index
    %89 = vector.load %arg6[%c0_61, %c0_62] : memref<4x1xf32, #tpu.memory_space<vmem>>, vector<4x1xf32>
    %90 = vector.broadcast %89 : vector<4x1xf32> to vector<4x256xf32>
    %91 = arith.mulf %90, %88 : vector<4x256xf32>
    %c0_63 = arith.constant 0 : index
    %c0_64 = arith.constant 0 : index
    %92 = vector.load %arg7[%c0_63, %c0_64] : memref<4x1xf32, #tpu.memory_space<vmem>>, vector<4x1xf32>
    %93 = vector.broadcast %92 : vector<4x1xf32> to vector<4x256xf32>
    %94 = arith.addf %91, %93 : vector<4x256xf32>
    %cst_65 = arith.constant 0.000000e+00 : f32
    %95 = vector.broadcast %cst_65 : f32 to vector<4x256xf32>
    %c17_i32_66 = arith.constant 17 : i32
    %96 = tpu.dynamic_rotate %1 by %c17_i32_66 dim 1 : vector<4x256xf32>, i32 -> vector<4x256xf32>
    %c0_67 = arith.constant 0 : index
    %c0_68 = arith.constant 0 : index
    %c0_69 = arith.constant 0 : index
    %97 = vector.load %arg3[%c0_67, %c0_68, %c0_69] : memref<9x1x256xf32, #tpu.memory_space<vmem>>, vector<1x1x256xf32>
    %98 = vector.shape_cast %97 : vector<1x1x256xf32> to vector<1x256xf32>
    %99 = vector.broadcast %98 : vector<1x256xf32> to vector<4x256xf32>
    %100 = arith.mulf %96, %99 : vector<4x256xf32>
    %c0_70 = arith.constant 0 : index
    %c0_71 = arith.constant 0 : index
    %c0_72 = arith.constant 0 : index
    %101 = vector.load %arg8[%c0_70, %c0_71, %c0_72] : memref<9x4x4xf32, #tpu.memory_space<vmem>>, vector<1x4x4xf32>
    %102 = vector.shape_cast %101 : vector<1x4x4xf32> to vector<4x4xf32>
    %cst_73 = arith.constant dense<0.000000e+00> : vector<4x256xf32>
    %103 = tpu.matmul %102, %100, %cst_73 {dimension_numbers = #tpu.dot_dimension_numbers<[1], [0], [0], [1], [0, 0, 1, 1], [], []>} : vector<4x4xf32>, vector<4x256xf32>, vector<4x256xf32> -> vector<4x256xf32>
    %104 = arith.addf %95, %103 : vector<4x256xf32>
    %c16_i32_74 = arith.constant 16 : i32
    %105 = tpu.dynamic_rotate %1 by %c16_i32_74 dim 1 : vector<4x256xf32>, i32 -> vector<4x256xf32>
    %c1_75 = arith.constant 1 : index
    %c0_76 = arith.constant 0 : index
    %c0_77 = arith.constant 0 : index
    %106 = vector.load %arg3[%c1_75, %c0_76, %c0_77] : memref<9x1x256xf32, #tpu.memory_space<vmem>>, vector<1x1x256xf32>
    %107 = vector.shape_cast %106 : vector<1x1x256xf32> to vector<1x256xf32>
    %108 = vector.broadcast %107 : vector<1x256xf32> to vector<4x256xf32>
    %109 = arith.mulf %105, %108 : vector<4x256xf32>
    %c1_78 = arith.constant 1 : index
    %c0_79 = arith.constant 0 : index
    %c0_80 = arith.constant 0 : index
    %110 = vector.load %arg8[%c1_78, %c0_79, %c0_80] : memref<9x4x4xf32, #tpu.memory_space<vmem>>, vector<1x4x4xf32>
    %111 = vector.shape_cast %110 : vector<1x4x4xf32> to vector<4x4xf32>
    %cst_81 = arith.constant dense<0.000000e+00> : vector<4x256xf32>
    %112 = tpu.matmul %111, %109, %cst_81 {dimension_numbers = #tpu.dot_dimension_numbers<[1], [0], [0], [1], [0, 0, 1, 1], [], []>} : vector<4x4xf32>, vector<4x256xf32>, vector<4x256xf32> -> vector<4x256xf32>
    %113 = arith.addf %104, %112 : vector<4x256xf32>
    %c15_i32_82 = arith.constant 15 : i32
    %114 = tpu.dynamic_rotate %1 by %c15_i32_82 dim 1 : vector<4x256xf32>, i32 -> vector<4x256xf32>
    %c2_83 = arith.constant 2 : index
    %c0_84 = arith.constant 0 : index
    %c0_85 = arith.constant 0 : index
    %115 = vector.load %arg3[%c2_83, %c0_84, %c0_85] : memref<9x1x256xf32, #tpu.memory_space<vmem>>, vector<1x1x256xf32>
    %116 = vector.shape_cast %115 : vector<1x1x256xf32> to vector<1x256xf32>
    %117 = vector.broadcast %116 : vector<1x256xf32> to vector<4x256xf32>
    %118 = arith.mulf %114, %117 : vector<4x256xf32>
    %c2_86 = arith.constant 2 : index
    %c0_87 = arith.constant 0 : index
    %c0_88 = arith.constant 0 : index
    %119 = vector.load %arg8[%c2_86, %c0_87, %c0_88] : memref<9x4x4xf32, #tpu.memory_space<vmem>>, vector<1x4x4xf32>
    %120 = vector.shape_cast %119 : vector<1x4x4xf32> to vector<4x4xf32>
    %cst_89 = arith.constant dense<0.000000e+00> : vector<4x256xf32>
    %121 = tpu.matmul %120, %118, %cst_89 {dimension_numbers = #tpu.dot_dimension_numbers<[1], [0], [0], [1], [0, 0, 1, 1], [], []>} : vector<4x4xf32>, vector<4x256xf32>, vector<4x256xf32> -> vector<4x256xf32>
    %122 = arith.addf %113, %121 : vector<4x256xf32>
    %c1_i32_90 = arith.constant 1 : i32
    %123 = tpu.dynamic_rotate %1 by %c1_i32_90 dim 1 : vector<4x256xf32>, i32 -> vector<4x256xf32>
    %c3_91 = arith.constant 3 : index
    %c0_92 = arith.constant 0 : index
    %c0_93 = arith.constant 0 : index
    %124 = vector.load %arg3[%c3_91, %c0_92, %c0_93] : memref<9x1x256xf32, #tpu.memory_space<vmem>>, vector<1x1x256xf32>
    %125 = vector.shape_cast %124 : vector<1x1x256xf32> to vector<1x256xf32>
    %126 = vector.broadcast %125 : vector<1x256xf32> to vector<4x256xf32>
    %127 = arith.mulf %123, %126 : vector<4x256xf32>
    %c3_94 = arith.constant 3 : index
    %c0_95 = arith.constant 0 : index
    %c0_96 = arith.constant 0 : index
    %128 = vector.load %arg8[%c3_94, %c0_95, %c0_96] : memref<9x4x4xf32, #tpu.memory_space<vmem>>, vector<1x4x4xf32>
    %129 = vector.shape_cast %128 : vector<1x4x4xf32> to vector<4x4xf32>
    %cst_97 = arith.constant dense<0.000000e+00> : vector<4x256xf32>
    %130 = tpu.matmul %129, %127, %cst_97 {dimension_numbers = #tpu.dot_dimension_numbers<[1], [0], [0], [1], [0, 0, 1, 1], [], []>} : vector<4x4xf32>, vector<4x256xf32>, vector<4x256xf32> -> vector<4x256xf32>
    %131 = arith.addf %122, %130 : vector<4x256xf32>
    %c4_98 = arith.constant 4 : index
    %c0_99 = arith.constant 0 : index
    %c0_100 = arith.constant 0 : index
    %132 = vector.load %arg8[%c4_98, %c0_99, %c0_100] : memref<9x4x4xf32, #tpu.memory_space<vmem>>, vector<1x4x4xf32>
    %133 = vector.shape_cast %132 : vector<1x4x4xf32> to vector<4x4xf32>
    %cst_101 = arith.constant dense<0.000000e+00> : vector<4x256xf32>
    %134 = tpu.matmul %133, %1, %cst_101 {dimension_numbers = #tpu.dot_dimension_numbers<[1], [0], [0], [1], [0, 0, 1, 1], [], []>} : vector<4x4xf32>, vector<4x256xf32>, vector<4x256xf32> -> vector<4x256xf32>
    %135 = arith.addf %131, %134 : vector<4x256xf32>
    %c255_i32_102 = arith.constant 255 : i32
    %136 = tpu.dynamic_rotate %1 by %c255_i32_102 dim 1 : vector<4x256xf32>, i32 -> vector<4x256xf32>
    %c5_103 = arith.constant 5 : index
    %c0_104 = arith.constant 0 : index
    %c0_105 = arith.constant 0 : index
    %137 = vector.load %arg3[%c5_103, %c0_104, %c0_105] : memref<9x1x256xf32, #tpu.memory_space<vmem>>, vector<1x1x256xf32>
    %138 = vector.shape_cast %137 : vector<1x1x256xf32> to vector<1x256xf32>
    %139 = vector.broadcast %138 : vector<1x256xf32> to vector<4x256xf32>
    %140 = arith.mulf %136, %139 : vector<4x256xf32>
    %c5_106 = arith.constant 5 : index
    %c0_107 = arith.constant 0 : index
    %c0_108 = arith.constant 0 : index
    %141 = vector.load %arg8[%c5_106, %c0_107, %c0_108] : memref<9x4x4xf32, #tpu.memory_space<vmem>>, vector<1x4x4xf32>
    %142 = vector.shape_cast %141 : vector<1x4x4xf32> to vector<4x4xf32>
    %cst_109 = arith.constant dense<0.000000e+00> : vector<4x256xf32>
    %143 = tpu.matmul %142, %140, %cst_109 {dimension_numbers = #tpu.dot_dimension_numbers<[1], [0], [0], [1], [0, 0, 1, 1], [], []>} : vector<4x4xf32>, vector<4x256xf32>, vector<4x256xf32> -> vector<4x256xf32>
    %144 = arith.addf %135, %143 : vector<4x256xf32>
    %c241_i32_110 = arith.constant 241 : i32
    %145 = tpu.dynamic_rotate %1 by %c241_i32_110 dim 1 : vector<4x256xf32>, i32 -> vector<4x256xf32>
    %c6_111 = arith.constant 6 : index
    %c0_112 = arith.constant 0 : index
    %c0_113 = arith.constant 0 : index
    %146 = vector.load %arg3[%c6_111, %c0_112, %c0_113] : memref<9x1x256xf32, #tpu.memory_space<vmem>>, vector<1x1x256xf32>
    %147 = vector.shape_cast %146 : vector<1x1x256xf32> to vector<1x256xf32>
    %148 = vector.broadcast %147 : vector<1x256xf32> to vector<4x256xf32>
    %149 = arith.mulf %145, %148 : vector<4x256xf32>
    %c6_114 = arith.constant 6 : index
    %c0_115 = arith.constant 0 : index
    %c0_116 = arith.constant 0 : index
    %150 = vector.load %arg8[%c6_114, %c0_115, %c0_116] : memref<9x4x4xf32, #tpu.memory_space<vmem>>, vector<1x4x4xf32>
    %151 = vector.shape_cast %150 : vector<1x4x4xf32> to vector<4x4xf32>
    %cst_117 = arith.constant dense<0.000000e+00> : vector<4x256xf32>
    %152 = tpu.matmul %151, %149, %cst_117 {dimension_numbers = #tpu.dot_dimension_numbers<[1], [0], [0], [1], [0, 0, 1, 1], [], []>} : vector<4x4xf32>, vector<4x256xf32>, vector<4x256xf32> -> vector<4x256xf32>
    %153 = arith.addf %144, %152 : vector<4x256xf32>
    %c240_i32_118 = arith.constant 240 : i32
    %154 = tpu.dynamic_rotate %1 by %c240_i32_118 dim 1 : vector<4x256xf32>, i32 -> vector<4x256xf32>
    %c7_119 = arith.constant 7 : index
    %c0_120 = arith.constant 0 : index
    %c0_121 = arith.constant 0 : index
    %155 = vector.load %arg3[%c7_119, %c0_120, %c0_121] : memref<9x1x256xf32, #tpu.memory_space<vmem>>, vector<1x1x256xf32>
    %156 = vector.shape_cast %155 : vector<1x1x256xf32> to vector<1x256xf32>
    %157 = vector.broadcast %156 : vector<1x256xf32> to vector<4x256xf32>
    %158 = arith.mulf %154, %157 : vector<4x256xf32>
    %c7_122 = arith.constant 7 : index
    %c0_123 = arith.constant 0 : index
    %c0_124 = arith.constant 0 : index
    %159 = vector.load %arg8[%c7_122, %c0_123, %c0_124] : memref<9x4x4xf32, #tpu.memory_space<vmem>>, vector<1x4x4xf32>
    %160 = vector.shape_cast %159 : vector<1x4x4xf32> to vector<4x4xf32>
    %cst_125 = arith.constant dense<0.000000e+00> : vector<4x256xf32>
    %161 = tpu.matmul %160, %158, %cst_125 {dimension_numbers = #tpu.dot_dimension_numbers<[1], [0], [0], [1], [0, 0, 1, 1], [], []>} : vector<4x4xf32>, vector<4x256xf32>, vector<4x256xf32> -> vector<4x256xf32>
    %162 = arith.addf %153, %161 : vector<4x256xf32>
    %c239_i32_126 = arith.constant 239 : i32
    %163 = tpu.dynamic_rotate %1 by %c239_i32_126 dim 1 : vector<4x256xf32>, i32 -> vector<4x256xf32>
    %c8_127 = arith.constant 8 : index
    %c0_128 = arith.constant 0 : index
    %c0_129 = arith.constant 0 : index
    %164 = vector.load %arg3[%c8_127, %c0_128, %c0_129] : memref<9x1x256xf32, #tpu.memory_space<vmem>>, vector<1x1x256xf32>
    %165 = vector.shape_cast %164 : vector<1x1x256xf32> to vector<1x256xf32>
    %166 = vector.broadcast %165 : vector<1x256xf32> to vector<4x256xf32>
    %167 = arith.mulf %163, %166 : vector<4x256xf32>
    %c8_130 = arith.constant 8 : index
    %c0_131 = arith.constant 0 : index
    %c0_132 = arith.constant 0 : index
    %168 = vector.load %arg8[%c8_130, %c0_131, %c0_132] : memref<9x4x4xf32, #tpu.memory_space<vmem>>, vector<1x4x4xf32>
    %169 = vector.shape_cast %168 : vector<1x4x4xf32> to vector<4x4xf32>
    %cst_133 = arith.constant dense<0.000000e+00> : vector<4x256xf32>
    %170 = tpu.matmul %169, %167, %cst_133 {dimension_numbers = #tpu.dot_dimension_numbers<[1], [0], [0], [1], [0, 0, 1, 1], [], []>} : vector<4x4xf32>, vector<4x256xf32>, vector<4x256xf32> -> vector<4x256xf32>
    %171 = arith.addf %162, %170 : vector<4x256xf32>
    %cst_134 = arith.constant 0.000000e+00 : f32
    %172 = vector.broadcast %cst_134 : f32 to vector<4x256xf32>
    %c17_i32_135 = arith.constant 17 : i32
    %173 = tpu.dynamic_rotate %94 by %c17_i32_135 dim 1 : vector<4x256xf32>, i32 -> vector<4x256xf32>
    %c0_136 = arith.constant 0 : index
    %c0_137 = arith.constant 0 : index
    %c0_138 = arith.constant 0 : index
    %174 = vector.load %arg3[%c0_136, %c0_137, %c0_138] : memref<9x1x256xf32, #tpu.memory_space<vmem>>, vector<1x1x256xf32>
    %175 = vector.shape_cast %174 : vector<1x1x256xf32> to vector<1x256xf32>
    %176 = vector.broadcast %175 : vector<1x256xf32> to vector<4x256xf32>
    %177 = arith.mulf %173, %176 : vector<4x256xf32>
    %c0_139 = arith.constant 0 : index
    %c0_140 = arith.constant 0 : index
    %c0_141 = arith.constant 0 : index
    %178 = vector.load %arg9[%c0_139, %c0_140, %c0_141] : memref<9x4x4xf32, #tpu.memory_space<vmem>>, vector<1x4x4xf32>
    %179 = vector.shape_cast %178 : vector<1x4x4xf32> to vector<4x4xf32>
    %cst_142 = arith.constant dense<0.000000e+00> : vector<4x256xf32>
    %180 = tpu.matmul %179, %177, %cst_142 {dimension_numbers = #tpu.dot_dimension_numbers<[1], [0], [0], [1], [0, 0, 1, 1], [], []>} : vector<4x4xf32>, vector<4x256xf32>, vector<4x256xf32> -> vector<4x256xf32>
    %181 = arith.addf %172, %180 : vector<4x256xf32>
    %c16_i32_143 = arith.constant 16 : i32
    %182 = tpu.dynamic_rotate %94 by %c16_i32_143 dim 1 : vector<4x256xf32>, i32 -> vector<4x256xf32>
    %c1_144 = arith.constant 1 : index
    %c0_145 = arith.constant 0 : index
    %c0_146 = arith.constant 0 : index
    %183 = vector.load %arg3[%c1_144, %c0_145, %c0_146] : memref<9x1x256xf32, #tpu.memory_space<vmem>>, vector<1x1x256xf32>
    %184 = vector.shape_cast %183 : vector<1x1x256xf32> to vector<1x256xf32>
    %185 = vector.broadcast %184 : vector<1x256xf32> to vector<4x256xf32>
    %186 = arith.mulf %182, %185 : vector<4x256xf32>
    %c1_147 = arith.constant 1 : index
    %c0_148 = arith.constant 0 : index
    %c0_149 = arith.constant 0 : index
    %187 = vector.load %arg9[%c1_147, %c0_148, %c0_149] : memref<9x4x4xf32, #tpu.memory_space<vmem>>, vector<1x4x4xf32>
    %188 = vector.shape_cast %187 : vector<1x4x4xf32> to vector<4x4xf32>
    %cst_150 = arith.constant dense<0.000000e+00> : vector<4x256xf32>
    %189 = tpu.matmul %188, %186, %cst_150 {dimension_numbers = #tpu.dot_dimension_numbers<[1], [0], [0], [1], [0, 0, 1, 1], [], []>} : vector<4x4xf32>, vector<4x256xf32>, vector<4x256xf32> -> vector<4x256xf32>
    %190 = arith.addf %181, %189 : vector<4x256xf32>
    %c15_i32_151 = arith.constant 15 : i32
    %191 = tpu.dynamic_rotate %94 by %c15_i32_151 dim 1 : vector<4x256xf32>, i32 -> vector<4x256xf32>
    %c2_152 = arith.constant 2 : index
    %c0_153 = arith.constant 0 : index
    %c0_154 = arith.constant 0 : index
    %192 = vector.load %arg3[%c2_152, %c0_153, %c0_154] : memref<9x1x256xf32, #tpu.memory_space<vmem>>, vector<1x1x256xf32>
    %193 = vector.shape_cast %192 : vector<1x1x256xf32> to vector<1x256xf32>
    %194 = vector.broadcast %193 : vector<1x256xf32> to vector<4x256xf32>
    %195 = arith.mulf %191, %194 : vector<4x256xf32>
    %c2_155 = arith.constant 2 : index
    %c0_156 = arith.constant 0 : index
    %c0_157 = arith.constant 0 : index
    %196 = vector.load %arg9[%c2_155, %c0_156, %c0_157] : memref<9x4x4xf32, #tpu.memory_space<vmem>>, vector<1x4x4xf32>
    %197 = vector.shape_cast %196 : vector<1x4x4xf32> to vector<4x4xf32>
    %cst_158 = arith.constant dense<0.000000e+00> : vector<4x256xf32>
    %198 = tpu.matmul %197, %195, %cst_158 {dimension_numbers = #tpu.dot_dimension_numbers<[1], [0], [0], [1], [0, 0, 1, 1], [], []>} : vector<4x4xf32>, vector<4x256xf32>, vector<4x256xf32> -> vector<4x256xf32>
    %199 = arith.addf %190, %198 : vector<4x256xf32>
    %c1_i32_159 = arith.constant 1 : i32
    %200 = tpu.dynamic_rotate %94 by %c1_i32_159 dim 1 : vector<4x256xf32>, i32 -> vector<4x256xf32>
    %c3_160 = arith.constant 3 : index
    %c0_161 = arith.constant 0 : index
    %c0_162 = arith.constant 0 : index
    %201 = vector.load %arg3[%c3_160, %c0_161, %c0_162] : memref<9x1x256xf32, #tpu.memory_space<vmem>>, vector<1x1x256xf32>
    %202 = vector.shape_cast %201 : vector<1x1x256xf32> to vector<1x256xf32>
    %203 = vector.broadcast %202 : vector<1x256xf32> to vector<4x256xf32>
    %204 = arith.mulf %200, %203 : vector<4x256xf32>
    %c3_163 = arith.constant 3 : index
    %c0_164 = arith.constant 0 : index
    %c0_165 = arith.constant 0 : index
    %205 = vector.load %arg9[%c3_163, %c0_164, %c0_165] : memref<9x4x4xf32, #tpu.memory_space<vmem>>, vector<1x4x4xf32>
    %206 = vector.shape_cast %205 : vector<1x4x4xf32> to vector<4x4xf32>
    %cst_166 = arith.constant dense<0.000000e+00> : vector<4x256xf32>
    %207 = tpu.matmul %206, %204, %cst_166 {dimension_numbers = #tpu.dot_dimension_numbers<[1], [0], [0], [1], [0, 0, 1, 1], [], []>} : vector<4x4xf32>, vector<4x256xf32>, vector<4x256xf32> -> vector<4x256xf32>
    %208 = arith.addf %199, %207 : vector<4x256xf32>
    %c4_167 = arith.constant 4 : index
    %c0_168 = arith.constant 0 : index
    %c0_169 = arith.constant 0 : index
    %209 = vector.load %arg9[%c4_167, %c0_168, %c0_169] : memref<9x4x4xf32, #tpu.memory_space<vmem>>, vector<1x4x4xf32>
    %210 = vector.shape_cast %209 : vector<1x4x4xf32> to vector<4x4xf32>
    %cst_170 = arith.constant dense<0.000000e+00> : vector<4x256xf32>
    %211 = tpu.matmul %210, %94, %cst_170 {dimension_numbers = #tpu.dot_dimension_numbers<[1], [0], [0], [1], [0, 0, 1, 1], [], []>} : vector<4x4xf32>, vector<4x256xf32>, vector<4x256xf32> -> vector<4x256xf32>
    %212 = arith.addf %208, %211 : vector<4x256xf32>
    %c255_i32_171 = arith.constant 255 : i32
    %213 = tpu.dynamic_rotate %94 by %c255_i32_171 dim 1 : vector<4x256xf32>, i32 -> vector<4x256xf32>
    %c5_172 = arith.constant 5 : index
    %c0_173 = arith.constant 0 : index
    %c0_174 = arith.constant 0 : index
    %214 = vector.load %arg3[%c5_172, %c0_173, %c0_174] : memref<9x1x256xf32, #tpu.memory_space<vmem>>, vector<1x1x256xf32>
    %215 = vector.shape_cast %214 : vector<1x1x256xf32> to vector<1x256xf32>
    %216 = vector.broadcast %215 : vector<1x256xf32> to vector<4x256xf32>
    %217 = arith.mulf %213, %216 : vector<4x256xf32>
    %c5_175 = arith.constant 5 : index
    %c0_176 = arith.constant 0 : index
    %c0_177 = arith.constant 0 : index
    %218 = vector.load %arg9[%c5_175, %c0_176, %c0_177] : memref<9x4x4xf32, #tpu.memory_space<vmem>>, vector<1x4x4xf32>
    %219 = vector.shape_cast %218 : vector<1x4x4xf32> to vector<4x4xf32>
    %cst_178 = arith.constant dense<0.000000e+00> : vector<4x256xf32>
    %220 = tpu.matmul %219, %217, %cst_178 {dimension_numbers = #tpu.dot_dimension_numbers<[1], [0], [0], [1], [0, 0, 1, 1], [], []>} : vector<4x4xf32>, vector<4x256xf32>, vector<4x256xf32> -> vector<4x256xf32>
    %221 = arith.addf %212, %220 : vector<4x256xf32>
    %c241_i32_179 = arith.constant 241 : i32
    %222 = tpu.dynamic_rotate %94 by %c241_i32_179 dim 1 : vector<4x256xf32>, i32 -> vector<4x256xf32>
    %c6_180 = arith.constant 6 : index
    %c0_181 = arith.constant 0 : index
    %c0_182 = arith.constant 0 : index
    %223 = vector.load %arg3[%c6_180, %c0_181, %c0_182] : memref<9x1x256xf32, #tpu.memory_space<vmem>>, vector<1x1x256xf32>
    %224 = vector.shape_cast %223 : vector<1x1x256xf32> to vector<1x256xf32>
    %225 = vector.broadcast %224 : vector<1x256xf32> to vector<4x256xf32>
    %226 = arith.mulf %222, %225 : vector<4x256xf32>
    %c6_183 = arith.constant 6 : index
    %c0_184 = arith.constant 0 : index
    %c0_185 = arith.constant 0 : index
    %227 = vector.load %arg9[%c6_183, %c0_184, %c0_185] : memref<9x4x4xf32, #tpu.memory_space<vmem>>, vector<1x4x4xf32>
    %228 = vector.shape_cast %227 : vector<1x4x4xf32> to vector<4x4xf32>
    %cst_186 = arith.constant dense<0.000000e+00> : vector<4x256xf32>
    %229 = tpu.matmul %228, %226, %cst_186 {dimension_numbers = #tpu.dot_dimension_numbers<[1], [0], [0], [1], [0, 0, 1, 1], [], []>} : vector<4x4xf32>, vector<4x256xf32>, vector<4x256xf32> -> vector<4x256xf32>
    %230 = arith.addf %221, %229 : vector<4x256xf32>
    %c240_i32_187 = arith.constant 240 : i32
    %231 = tpu.dynamic_rotate %94 by %c240_i32_187 dim 1 : vector<4x256xf32>, i32 -> vector<4x256xf32>
    %c7_188 = arith.constant 7 : index
    %c0_189 = arith.constant 0 : index
    %c0_190 = arith.constant 0 : index
    %232 = vector.load %arg3[%c7_188, %c0_189, %c0_190] : memref<9x1x256xf32, #tpu.memory_space<vmem>>, vector<1x1x256xf32>
    %233 = vector.shape_cast %232 : vector<1x1x256xf32> to vector<1x256xf32>
    %234 = vector.broadcast %233 : vector<1x256xf32> to vector<4x256xf32>
    %235 = arith.mulf %231, %234 : vector<4x256xf32>
    %c7_191 = arith.constant 7 : index
    %c0_192 = arith.constant 0 : index
    %c0_193 = arith.constant 0 : index
    %236 = vector.load %arg9[%c7_191, %c0_192, %c0_193] : memref<9x4x4xf32, #tpu.memory_space<vmem>>, vector<1x4x4xf32>
    %237 = vector.shape_cast %236 : vector<1x4x4xf32> to vector<4x4xf32>
    %cst_194 = arith.constant dense<0.000000e+00> : vector<4x256xf32>
    %238 = tpu.matmul %237, %235, %cst_194 {dimension_numbers = #tpu.dot_dimension_numbers<[1], [0], [0], [1], [0, 0, 1, 1], [], []>} : vector<4x4xf32>, vector<4x256xf32>, vector<4x256xf32> -> vector<4x256xf32>
    %239 = arith.addf %230, %238 : vector<4x256xf32>
    %c239_i32_195 = arith.constant 239 : i32
    %240 = tpu.dynamic_rotate %94 by %c239_i32_195 dim 1 : vector<4x256xf32>, i32 -> vector<4x256xf32>
    %c8_196 = arith.constant 8 : index
    %c0_197 = arith.constant 0 : index
    %c0_198 = arith.constant 0 : index
    %241 = vector.load %arg3[%c8_196, %c0_197, %c0_198] : memref<9x1x256xf32, #tpu.memory_space<vmem>>, vector<1x1x256xf32>
    %242 = vector.shape_cast %241 : vector<1x1x256xf32> to vector<1x256xf32>
    %243 = vector.broadcast %242 : vector<1x256xf32> to vector<4x256xf32>
    %244 = arith.mulf %240, %243 : vector<4x256xf32>
    %c8_199 = arith.constant 8 : index
    %c0_200 = arith.constant 0 : index
    %c0_201 = arith.constant 0 : index
    %245 = vector.load %arg9[%c8_199, %c0_200, %c0_201] : memref<9x4x4xf32, #tpu.memory_space<vmem>>, vector<1x4x4xf32>
    %246 = vector.shape_cast %245 : vector<1x4x4xf32> to vector<4x4xf32>
    %cst_202 = arith.constant dense<0.000000e+00> : vector<4x256xf32>
    %247 = tpu.matmul %246, %244, %cst_202 {dimension_numbers = #tpu.dot_dimension_numbers<[1], [0], [0], [1], [0, 0, 1, 1], [], []>} : vector<4x4xf32>, vector<4x256xf32>, vector<4x256xf32> -> vector<4x256xf32>
    %248 = arith.addf %239, %247 : vector<4x256xf32>
    %249 = arith.addf %171, %248 : vector<4x256xf32>
    %c0_203 = arith.constant 0 : index
    %c0_204 = arith.constant 0 : index
    %250 = vector.load %arg10[%c0_203, %c0_204] : memref<4x1xf32, #tpu.memory_space<vmem>>, vector<4x1xf32>
    %251 = vector.broadcast %250 : vector<4x1xf32> to vector<4x256xf32>
    %252 = arith.addf %249, %251 : vector<4x256xf32>
    %cst_205 = arith.constant 3.000000e+00 : f32
    %253 = vector.broadcast %cst_205 : f32 to vector<4x256xf32>
    %254 = arith.addf %252, %253 : vector<4x256xf32>
    %cst_206 = arith.constant 0.000000e+00 : f32
    %cst_207 = arith.constant 6.000000e+00 : f32
    %255 = vector.broadcast %cst_206 : f32 to vector<4x256xf32>
    %256 = arith.maximumf %255, %254 : vector<4x256xf32>
    %257 = vector.broadcast %cst_207 : f32 to vector<4x256xf32>
    %258 = arith.minimumf %257, %256 : vector<4x256xf32>
    %259 = arith.mulf %252, %258 : vector<4x256xf32>
    %cst_208 = arith.constant 0.166666672 : f32
    %260 = vector.broadcast %cst_208 : f32 to vector<4x256xf32>
    %261 = arith.mulf %259, %260 : vector<4x256xf32>
    %cst_209 = arith.constant 0.000000e+00 : f32
    %262 = vector.broadcast %cst_209 : f32 to vector<4x256xf32>
    %c17_i32_210 = arith.constant 17 : i32
    %263 = tpu.dynamic_rotate %261 by %c17_i32_210 dim 1 : vector<4x256xf32>, i32 -> vector<4x256xf32>
    %c0_211 = arith.constant 0 : index
    %c0_212 = arith.constant 0 : index
    %c0_213 = arith.constant 0 : index
    %264 = vector.load %arg3[%c0_211, %c0_212, %c0_213] : memref<9x1x256xf32, #tpu.memory_space<vmem>>, vector<1x1x256xf32>
    %265 = vector.shape_cast %264 : vector<1x1x256xf32> to vector<1x256xf32>
    %266 = vector.broadcast %265 : vector<1x256xf32> to vector<4x256xf32>
    %267 = arith.mulf %263, %266 : vector<4x256xf32>
    %c0_214 = arith.constant 0 : index
    %c0_215 = arith.constant 0 : index
    %c0_216 = arith.constant 0 : index
    %268 = vector.load %arg11[%c0_214, %c0_215, %c0_216] : memref<9x4x4xf32, #tpu.memory_space<vmem>>, vector<1x4x4xf32>
    %269 = vector.shape_cast %268 : vector<1x4x4xf32> to vector<4x4xf32>
    %cst_217 = arith.constant dense<0.000000e+00> : vector<4x256xf32>
    %270 = tpu.matmul %269, %267, %cst_217 {dimension_numbers = #tpu.dot_dimension_numbers<[1], [0], [0], [1], [0, 0, 1, 1], [], []>} : vector<4x4xf32>, vector<4x256xf32>, vector<4x256xf32> -> vector<4x256xf32>
    %271 = arith.addf %262, %270 : vector<4x256xf32>
    %c16_i32_218 = arith.constant 16 : i32
    %272 = tpu.dynamic_rotate %261 by %c16_i32_218 dim 1 : vector<4x256xf32>, i32 -> vector<4x256xf32>
    %c1_219 = arith.constant 1 : index
    %c0_220 = arith.constant 0 : index
    %c0_221 = arith.constant 0 : index
    %273 = vector.load %arg3[%c1_219, %c0_220, %c0_221] : memref<9x1x256xf32, #tpu.memory_space<vmem>>, vector<1x1x256xf32>
    %274 = vector.shape_cast %273 : vector<1x1x256xf32> to vector<1x256xf32>
    %275 = vector.broadcast %274 : vector<1x256xf32> to vector<4x256xf32>
    %276 = arith.mulf %272, %275 : vector<4x256xf32>
    %c1_222 = arith.constant 1 : index
    %c0_223 = arith.constant 0 : index
    %c0_224 = arith.constant 0 : index
    %277 = vector.load %arg11[%c1_222, %c0_223, %c0_224] : memref<9x4x4xf32, #tpu.memory_space<vmem>>, vector<1x4x4xf32>
    %278 = vector.shape_cast %277 : vector<1x4x4xf32> to vector<4x4xf32>
    %cst_225 = arith.constant dense<0.000000e+00> : vector<4x256xf32>
    %279 = tpu.matmul %278, %276, %cst_225 {dimension_numbers = #tpu.dot_dimension_numbers<[1], [0], [0], [1], [0, 0, 1, 1], [], []>} : vector<4x4xf32>, vector<4x256xf32>, vector<4x256xf32> -> vector<4x256xf32>
    %280 = arith.addf %271, %279 : vector<4x256xf32>
    %c15_i32_226 = arith.constant 15 : i32
    %281 = tpu.dynamic_rotate %261 by %c15_i32_226 dim 1 : vector<4x256xf32>, i32 -> vector<4x256xf32>
    %c2_227 = arith.constant 2 : index
    %c0_228 = arith.constant 0 : index
    %c0_229 = arith.constant 0 : index
    %282 = vector.load %arg3[%c2_227, %c0_228, %c0_229] : memref<9x1x256xf32, #tpu.memory_space<vmem>>, vector<1x1x256xf32>
    %283 = vector.shape_cast %282 : vector<1x1x256xf32> to vector<1x256xf32>
    %284 = vector.broadcast %283 : vector<1x256xf32> to vector<4x256xf32>
    %285 = arith.mulf %281, %284 : vector<4x256xf32>
    %c2_230 = arith.constant 2 : index
    %c0_231 = arith.constant 0 : index
    %c0_232 = arith.constant 0 : index
    %286 = vector.load %arg11[%c2_230, %c0_231, %c0_232] : memref<9x4x4xf32, #tpu.memory_space<vmem>>, vector<1x4x4xf32>
    %287 = vector.shape_cast %286 : vector<1x4x4xf32> to vector<4x4xf32>
    %cst_233 = arith.constant dense<0.000000e+00> : vector<4x256xf32>
    %288 = tpu.matmul %287, %285, %cst_233 {dimension_numbers = #tpu.dot_dimension_numbers<[1], [0], [0], [1], [0, 0, 1, 1], [], []>} : vector<4x4xf32>, vector<4x256xf32>, vector<4x256xf32> -> vector<4x256xf32>
    %289 = arith.addf %280, %288 : vector<4x256xf32>
    %c1_i32_234 = arith.constant 1 : i32
    %290 = tpu.dynamic_rotate %261 by %c1_i32_234 dim 1 : vector<4x256xf32>, i32 -> vector<4x256xf32>
    %c3_235 = arith.constant 3 : index
    %c0_236 = arith.constant 0 : index
    %c0_237 = arith.constant 0 : index
    %291 = vector.load %arg3[%c3_235, %c0_236, %c0_237] : memref<9x1x256xf32, #tpu.memory_space<vmem>>, vector<1x1x256xf32>
    %292 = vector.shape_cast %291 : vector<1x1x256xf32> to vector<1x256xf32>
    %293 = vector.broadcast %292 : vector<1x256xf32> to vector<4x256xf32>
    %294 = arith.mulf %290, %293 : vector<4x256xf32>
    %c3_238 = arith.constant 3 : index
    %c0_239 = arith.constant 0 : index
    %c0_240 = arith.constant 0 : index
    %295 = vector.load %arg11[%c3_238, %c0_239, %c0_240] : memref<9x4x4xf32, #tpu.memory_space<vmem>>, vector<1x4x4xf32>
    %296 = vector.shape_cast %295 : vector<1x4x4xf32> to vector<4x4xf32>
    %cst_241 = arith.constant dense<0.000000e+00> : vector<4x256xf32>
    %297 = tpu.matmul %296, %294, %cst_241 {dimension_numbers = #tpu.dot_dimension_numbers<[1], [0], [0], [1], [0, 0, 1, 1], [], []>} : vector<4x4xf32>, vector<4x256xf32>, vector<4x256xf32> -> vector<4x256xf32>
    %298 = arith.addf %289, %297 : vector<4x256xf32>
    %c4_242 = arith.constant 4 : index
    %c0_243 = arith.constant 0 : index
    %c0_244 = arith.constant 0 : index
    %299 = vector.load %arg11[%c4_242, %c0_243, %c0_244] : memref<9x4x4xf32, #tpu.memory_space<vmem>>, vector<1x4x4xf32>
    %300 = vector.shape_cast %299 : vector<1x4x4xf32> to vector<4x4xf32>
    %cst_245 = arith.constant dense<0.000000e+00> : vector<4x256xf32>
    %301 = tpu.matmul %300, %261, %cst_245 {dimension_numbers = #tpu.dot_dimension_numbers<[1], [0], [0], [1], [0, 0, 1, 1], [], []>} : vector<4x4xf32>, vector<4x256xf32>, vector<4x256xf32> -> vector<4x256xf32>
    %302 = arith.addf %298, %301 : vector<4x256xf32>
    %c255_i32_246 = arith.constant 255 : i32
    %303 = tpu.dynamic_rotate %261 by %c255_i32_246 dim 1 : vector<4x256xf32>, i32 -> vector<4x256xf32>
    %c5_247 = arith.constant 5 : index
    %c0_248 = arith.constant 0 : index
    %c0_249 = arith.constant 0 : index
    %304 = vector.load %arg3[%c5_247, %c0_248, %c0_249] : memref<9x1x256xf32, #tpu.memory_space<vmem>>, vector<1x1x256xf32>
    %305 = vector.shape_cast %304 : vector<1x1x256xf32> to vector<1x256xf32>
    %306 = vector.broadcast %305 : vector<1x256xf32> to vector<4x256xf32>
    %307 = arith.mulf %303, %306 : vector<4x256xf32>
    %c5_250 = arith.constant 5 : index
    %c0_251 = arith.constant 0 : index
    %c0_252 = arith.constant 0 : index
    %308 = vector.load %arg11[%c5_250, %c0_251, %c0_252] : memref<9x4x4xf32, #tpu.memory_space<vmem>>, vector<1x4x4xf32>
    %309 = vector.shape_cast %308 : vector<1x4x4xf32> to vector<4x4xf32>
    %cst_253 = arith.constant dense<0.000000e+00> : vector<4x256xf32>
    %310 = tpu.matmul %309, %307, %cst_253 {dimension_numbers = #tpu.dot_dimension_numbers<[1], [0], [0], [1], [0, 0, 1, 1], [], []>} : vector<4x4xf32>, vector<4x256xf32>, vector<4x256xf32> -> vector<4x256xf32>
    %311 = arith.addf %302, %310 : vector<4x256xf32>
    %c241_i32_254 = arith.constant 241 : i32
    %312 = tpu.dynamic_rotate %261 by %c241_i32_254 dim 1 : vector<4x256xf32>, i32 -> vector<4x256xf32>
    %c6_255 = arith.constant 6 : index
    %c0_256 = arith.constant 0 : index
    %c0_257 = arith.constant 0 : index
    %313 = vector.load %arg3[%c6_255, %c0_256, %c0_257] : memref<9x1x256xf32, #tpu.memory_space<vmem>>, vector<1x1x256xf32>
    %314 = vector.shape_cast %313 : vector<1x1x256xf32> to vector<1x256xf32>
    %315 = vector.broadcast %314 : vector<1x256xf32> to vector<4x256xf32>
    %316 = arith.mulf %312, %315 : vector<4x256xf32>
    %c6_258 = arith.constant 6 : index
    %c0_259 = arith.constant 0 : index
    %c0_260 = arith.constant 0 : index
    %317 = vector.load %arg11[%c6_258, %c0_259, %c0_260] : memref<9x4x4xf32, #tpu.memory_space<vmem>>, vector<1x4x4xf32>
    %318 = vector.shape_cast %317 : vector<1x4x4xf32> to vector<4x4xf32>
    %cst_261 = arith.constant dense<0.000000e+00> : vector<4x256xf32>
    %319 = tpu.matmul %318, %316, %cst_261 {dimension_numbers = #tpu.dot_dimension_numbers<[1], [0], [0], [1], [0, 0, 1, 1], [], []>} : vector<4x4xf32>, vector<4x256xf32>, vector<4x256xf32> -> vector<4x256xf32>
    %320 = arith.addf %311, %319 : vector<4x256xf32>
    %c240_i32_262 = arith.constant 240 : i32
    %321 = tpu.dynamic_rotate %261 by %c240_i32_262 dim 1 : vector<4x256xf32>, i32 -> vector<4x256xf32>
    %c7_263 = arith.constant 7 : index
    %c0_264 = arith.constant 0 : index
    %c0_265 = arith.constant 0 : index
    %322 = vector.load %arg3[%c7_263, %c0_264, %c0_265] : memref<9x1x256xf32, #tpu.memory_space<vmem>>, vector<1x1x256xf32>
    %323 = vector.shape_cast %322 : vector<1x1x256xf32> to vector<1x256xf32>
    %324 = vector.broadcast %323 : vector<1x256xf32> to vector<4x256xf32>
    %325 = arith.mulf %321, %324 : vector<4x256xf32>
    %c7_266 = arith.constant 7 : index
    %c0_267 = arith.constant 0 : index
    %c0_268 = arith.constant 0 : index
    %326 = vector.load %arg11[%c7_266, %c0_267, %c0_268] : memref<9x4x4xf32, #tpu.memory_space<vmem>>, vector<1x4x4xf32>
    %327 = vector.shape_cast %326 : vector<1x4x4xf32> to vector<4x4xf32>
    %cst_269 = arith.constant dense<0.000000e+00> : vector<4x256xf32>
    %328 = tpu.matmul %327, %325, %cst_269 {dimension_numbers = #tpu.dot_dimension_numbers<[1], [0], [0], [1], [0, 0, 1, 1], [], []>} : vector<4x4xf32>, vector<4x256xf32>, vector<4x256xf32> -> vector<4x256xf32>
    %329 = arith.addf %320, %328 : vector<4x256xf32>
    %c239_i32_270 = arith.constant 239 : i32
    %330 = tpu.dynamic_rotate %261 by %c239_i32_270 dim 1 : vector<4x256xf32>, i32 -> vector<4x256xf32>
    %c8_271 = arith.constant 8 : index
    %c0_272 = arith.constant 0 : index
    %c0_273 = arith.constant 0 : index
    %331 = vector.load %arg3[%c8_271, %c0_272, %c0_273] : memref<9x1x256xf32, #tpu.memory_space<vmem>>, vector<1x1x256xf32>
    %332 = vector.shape_cast %331 : vector<1x1x256xf32> to vector<1x256xf32>
    %333 = vector.broadcast %332 : vector<1x256xf32> to vector<4x256xf32>
    %334 = arith.mulf %330, %333 : vector<4x256xf32>
    %c8_274 = arith.constant 8 : index
    %c0_275 = arith.constant 0 : index
    %c0_276 = arith.constant 0 : index
    %335 = vector.load %arg11[%c8_274, %c0_275, %c0_276] : memref<9x4x4xf32, #tpu.memory_space<vmem>>, vector<1x4x4xf32>
    %336 = vector.shape_cast %335 : vector<1x4x4xf32> to vector<4x4xf32>
    %cst_277 = arith.constant dense<0.000000e+00> : vector<4x256xf32>
    %337 = tpu.matmul %336, %334, %cst_277 {dimension_numbers = #tpu.dot_dimension_numbers<[1], [0], [0], [1], [0, 0, 1, 1], [], []>} : vector<4x4xf32>, vector<4x256xf32>, vector<4x256xf32> -> vector<4x256xf32>
    %338 = arith.addf %329, %337 : vector<4x256xf32>
    %c0_278 = arith.constant 0 : index
    %c0_279 = arith.constant 0 : index
    %339 = vector.load %arg12[%c0_278, %c0_279] : memref<4x1xf32, #tpu.memory_space<vmem>>, vector<4x1xf32>
    %340 = vector.broadcast %339 : vector<4x1xf32> to vector<4x256xf32>
    %341 = arith.addf %338, %340 : vector<4x256xf32>
    %c0_280 = arith.constant 0 : index
    %c0_281 = arith.constant 0 : index
    %342 = vector.load %arg13[%c0_280, %c0_281] : memref<4x4xf32, #tpu.memory_space<vmem>>, vector<4x4xf32>
    %cst_282 = arith.constant dense<0.000000e+00> : vector<4x256xf32>
    %343 = tpu.matmul %342, %1, %cst_282 {dimension_numbers = #tpu.dot_dimension_numbers<[1], [0], [0], [1], [0, 0, 1, 1], [], []>} : vector<4x4xf32>, vector<4x256xf32>, vector<4x256xf32> -> vector<4x256xf32>
    %c0_283 = arith.constant 0 : index
    %c0_284 = arith.constant 0 : index
    %344 = vector.load %arg14[%c0_283, %c0_284] : memref<4x4xf32, #tpu.memory_space<vmem>>, vector<4x4xf32>
    %cst_285 = arith.constant dense<0.000000e+00> : vector<4x256xf32>
    %345 = tpu.matmul %344, %94, %cst_285 {dimension_numbers = #tpu.dot_dimension_numbers<[1], [0], [0], [1], [0, 0, 1, 1], [], []>} : vector<4x4xf32>, vector<4x256xf32>, vector<4x256xf32> -> vector<4x256xf32>
    %346 = arith.addf %343, %345 : vector<4x256xf32>
    %c0_286 = arith.constant 0 : index
    %c0_287 = arith.constant 0 : index
    %347 = vector.load %arg15[%c0_286, %c0_287] : memref<4x1xf32, #tpu.memory_space<vmem>>, vector<4x1xf32>
    %348 = vector.broadcast %347 : vector<4x1xf32> to vector<4x256xf32>
    %349 = arith.addf %346, %348 : vector<4x256xf32>
    %350 = arith.addf %341, %349 : vector<4x256xf32>
    %cst_288 = arith.constant 3.000000e+00 : f32
    %351 = vector.broadcast %cst_288 : f32 to vector<4x256xf32>
    %352 = arith.addf %350, %351 : vector<4x256xf32>
    %cst_289 = arith.constant 0.000000e+00 : f32
    %cst_290 = arith.constant 6.000000e+00 : f32
    %353 = vector.broadcast %cst_289 : f32 to vector<4x256xf32>
    %354 = arith.maximumf %353, %352 : vector<4x256xf32>
    %355 = vector.broadcast %cst_290 : f32 to vector<4x256xf32>
    %356 = arith.minimumf %355, %354 : vector<4x256xf32>
    %357 = arith.mulf %350, %356 : vector<4x256xf32>
    %cst_291 = arith.constant 0.166666672 : f32
    %358 = vector.broadcast %cst_291 : f32 to vector<4x256xf32>
    %359 = arith.mulf %357, %358 : vector<4x256xf32>
    %c0_292 = arith.constant 0 : index
    %c0_293 = arith.constant 0 : index
    %c0_294 = arith.constant 0 : index
    %360 = vector.load %arg16[%c0_292, %c0_293, %c0_294] : memref<1x4x256xf32, #tpu.memory_space<vmem>>, vector<1x4x256xf32>
    %361 = vector.shape_cast %360 : vector<1x4x256xf32> to vector<4x256xf32>
    %362 = vector.shape_cast %359 : vector<4x256xf32> to vector<1x4x256xf32>
    tpu.vector_store %arg16[%c0_292, %c0_293, %c0_294], %362 {strides = array<i32>} : memref<1x4x256xf32, #tpu.memory_space<vmem>>, vector<1x4x256xf32>,
    return
  }
  func.func @transform_0(%arg0: i32) -> (i32, i32, i32) {
    %c0_i32 = arith.constant 0 : i32
    %c0_i32_0 = arith.constant 0 : i32
    %c0_i32_1 = arith.constant 0 : i32
    return %arg0, %c0_i32, %c0_i32_0 : i32, i32, i32
  }
  func.func @transform_1(%arg0: i32) -> (i32, i32, i32) {
    %c0_i32 = arith.constant 0 : i32
    %c0_i32_0 = arith.constant 0 : i32
    %c0_i32_1 = arith.constant 0 : i32
    return %arg0, %c0_i32, %c0_i32_0 : i32, i32, i32
  }
  func.func @transform_2(%arg0: i32) -> (i32, i32, i32) {
    %c0_i32 = arith.constant 0 : i32
    %c0_i32_0 = arith.constant 0 : i32
    %c0_i32_1 = arith.constant 0 : i32
    %c0_i32_2 = arith.constant 0 : i32
    return %c0_i32, %c0_i32_0, %c0_i32_1 : i32, i32, i32
  }
  func.func @transform_3(%arg0: i32) -> (i32, i32, i32) {
    %c0_i32 = arith.constant 0 : i32
    %c0_i32_0 = arith.constant 0 : i32
    %c0_i32_1 = arith.constant 0 : i32
    %c0_i32_2 = arith.constant 0 : i32
    return %c0_i32, %c0_i32_0, %c0_i32_1 : i32, i32, i32
  }
  func.func @transform_4(%arg0: i32) -> (i32, i32) {
    %c0_i32 = arith.constant 0 : i32
    %c0_i32_0 = arith.constant 0 : i32
    %c0_i32_1 = arith.constant 0 : i32
    return %c0_i32, %c0_i32_0 : i32, i32
  }
  func.func @transform_5(%arg0: i32) -> (i32, i32) {
    %c0_i32 = arith.constant 0 : i32
    %c0_i32_0 = arith.constant 0 : i32
    %c0_i32_1 = arith.constant 0 : i32
    return %c0_i32, %c0_i32_0 : i32, i32
  }
  func.func @transform_6(%arg0: i32) -> (i32, i32) {
    %c0_i32 = arith.constant 0 : i32
    %c0_i32_0 = arith.constant 0 : i32
    %c0_i32_1 = arith.constant 0 : i32
    return %c0_i32, %c0_i32_0 : i32, i32
  }
  func.func @transform_7(%arg0: i32) -> (i32, i32, i32) {
    %c0_i32 = arith.constant 0 : i32
    %c0_i32_0 = arith.constant 0 : i32
    %c0_i32_1 = arith.constant 0 : i32
    %c0_i32_2 = arith.constant 0 : i32
    return %c0_i32, %c0_i32_0, %c0_i32_1 : i32, i32, i32
  }
  func.func @transform_8(%arg0: i32) -> (i32, i32, i32) {
    %c0_i32 = arith.constant 0 : i32
    %c0_i32_0 = arith.constant 0 : i32
    %c0_i32_1 = arith.constant 0 : i32
    %c0_i32_2 = arith.constant 0 : i32
    return %c0_i32, %c0_i32_0, %c0_i32_1 : i32, i32, i32
  }
  func.func @transform_9(%arg0: i32) -> (i32, i32) {
    %c0_i32 = arith.constant 0 : i32
    %c0_i32_0 = arith.constant 0 : i32
    %c0_i32_1 = arith.constant 0 : i32
    return %c0_i32, %c0_i32_0 : i32, i32
  }
  func.func @transform_10(%arg0: i32) -> (i32, i32, i32) {
    %c0_i32 = arith.constant 0 : i32
    %c0_i32_0 = arith.constant 0 : i32
    %c0_i32_1 = arith.constant 0 : i32
    %c0_i32_2 = arith.constant 0 : i32
    return %c0_i32, %c0_i32_0, %c0_i32_1 : i32, i32, i32
  }
  func.func @transform_11(%arg0: i32) -> (i32, i32) {
    %c0_i32 = arith.constant 0 : i32
    %c0_i32_0 = arith.constant 0 : i32
    %c0_i32_1 = arith.constant 0 : i32
    return %c0_i32, %c0_i32_0 : i32, i32
  }
  func.func @transform_12(%arg0: i32) -> (i32, i32) {
    %c0_i32 = arith.constant 0 : i32
    %c0_i32_0 = arith.constant 0 : i32
    %c0_i32_1 = arith.constant 0 : i32
    return %c0_i32, %c0_i32_0 : i32, i32
  }
  func.func @transform_13(%arg0: i32) -> (i32, i32) {
    %c0_i32 = arith.constant 0 : i32
    %c0_i32_0 = arith.constant 0 : i32
    %c0_i32_1 = arith.constant 0 : i32
    return %c0_i32, %c0_i32_0 : i32, i32
  }
  func.func @transform_14(%arg0: i32) -> (i32, i32) {
    %c0_i32 = arith.constant 0 : i32
    %c0_i32_0 = arith.constant 0 : i32
    %c0_i32_1 = arith.constant 0 : i32
    return %c0_i32, %c0_i32_0 : i32, i32
  }
  func.func @transform_15(%arg0: i32) -> (i32, i32, i32) {
    %c0_i32 = arith.constant 0 : i32
    %c0_i32_0 = arith.constant 0 : i32
    %c0_i32_1 = arith.constant 0 : i32
    return %arg0, %c0_i32, %c0_i32_0 : i32, i32, i32
  }
}

</mosaic_0001>

<bundles_post_ra>
// kernel: block_upsample_forward.2
= control target key start
LH: loop header
LB: loop body
LE: loop exit
PB: predicated region body
PF: predicated region fallthrough
CT: control target
= control target key end

     0   :  { %vm29_vm0 = vcmask 64512   ;;  %v129_v3 = vmov 0   ;;  %s171_s1 = inlined_call_operand.vmem [shape: f32[8,128], index: 1, kind: input, shape index: {}]   ;;  %s172_s0 = inlined_call_operand.vmem [shape: f32[16,8], index: 0, kind: input, shape index: {}]   ;;  %s173_s2 = inlined_call_operand.vmem [shape: f32[16,1], index: 2, kind: input, shape index: {}]   ;;  %s174_s3 = inlined_call_operand.vmem [shape: f32[16,128], index: 3, kind: output, shape index: {}]  }
   0x1   :  { %v16_v0 = vld [vmem:[%s171_s1] sm:$0xff]  ;;  %v15_v2 = vld [vmem:[%s172_s0 + $0x8] sm:$0xff]  ;;  %128 = vset.pattern.permute.xlu0 %v129_v3 }
   0x2   :  { %v14_v1 = vld [vmem:[%s172_s0] sm:$0xff]  ;;  %122 = vmatprep.subr.mxu0 %v16_v0  ;;  %v18_v5 = vld [vmem:[%s173_s2 + $0x8] sm:$0xff] }
   0x3   :  { %124 = vmatprep.mubr.msk.f32.mxu0 %vm29_vm0, %v14_v1  ;;  %v17_v4 = vld [vmem:[%s173_s2] sm:$0xff]  ;;  %123 = vmatpush3.msra.mxu0 %v16_v0 }
   0x4   :  { %21 = vperm.xlu0 %128, %v17_v4   ;;  %125 = vmatmul.mubr.msk.f32.vlgmr.msra.gmra.mxu0 %vm29_vm0, %v15_v2 }
   0x8   :  { %26 = vperm.xlu0 %128, %v18_v5  }
  0x7f   :  { %v22_v6 = vpop.permute.xlu0 %21 }
  0x83   :  { %v27_v7 = vpop.permute.xlu0 %26 }
  0xc4   :  { %v126_v8 = vpop.f32.mrf.mxu0 }
  0xc5   :  { %v108_v9 = vadd.f32 %v126_v8, %v27_v7 }
  0xc6   :  { %v102_v10 = vpop.f32.mrf.mxu0 }
  0xc7   :  { %112 = vst [vmem:[%s174_s3 + $0x8] sm:$0xff] %v108_v9  ;;  %v103_v11 = vadd.f32 %v102_v10, %v22_v6 }
  0xc9   :  { %111 = vst [vmem:[%s174_s3] sm:$0xff] %v103_v11 }

// kernel: block_upsample_forward.3
= control target key start
LH: loop header
LB: loop body
LE: loop exit
PB: predicated region body
PF: predicated region fallthrough
CT: control target
= control target key end

     0   :  { %s4484_s18 = smov 0   ;;  %s5235_s0 = inlined_call_operand.vmem [shape: f32[2,4,256], index: 0, kind: input, shape index: {}]   ;;  %s5236_s1 = inlined_call_operand.vmem [shape: f32[2,4,256], index: 1, kind: input, shape index: {}]   ;;  %s5237_s2 = inlined_call_operand.vmem [shape: f32[9,1,256], index: 2, kind: input, shape index: {}]   ;;  %s5238_s3 = inlined_call_operand.vmem [shape: f32[9,4,4], index: 3, kind: input, shape index: {}]   ;;  %s5239_s4 = inlined_call_operand.vmem [shape: f32[4,1], index: 4, kind: input, shape index: {}]   ;;  %s5240_s5 = inlined_call_operand.vmem [shape: f32[4,1], index: 5, kind: input, shape index: {}]   ;;  %s5241_s6 = inlined_call_operand.vmem [shape: f32[4,1], index: 6, kind: input, shape index: {}]   ;;  %s5242_s7 = inlined_call_operand.vmem [shape: f32[9,4,4], index: 7, kind: input, shape index: {}]   ;;  %s5243_s8 = inlined_call_operand.vmem [shape: f32[9,4,4], index: 8, kind: input, shape index: {}]   ;;  %s5244_s9 = inlined_call_operand.vmem [shape: f32[4,1], index: 9, kind: input, shape index: {}]   ;;  %s5245_s10 = inlined_call_operand.vmem [shape: f32[9,4,4], index: 10, kind: input, shape index: {}]   ;;  %s5246_s11 = inlined_call_operand.vmem [shape: f32[4,1], index: 11, kind: input, shape index: {}]   ;;  %s5247_s12 = inlined_call_operand.vmem [shape: f32[4,4], index: 12, kind: input, shape index: {}]   ;;  %s5248_s13 = inlined_call_operand.vmem [shape: f32[4,4], index: 13, kind: input, shape index: {}]   ;;  %s5249_s14 = inlined_call_operand.vmem [shape: f32[4,1], index: 14, kind: input, shape index: {}]   ;;  %s5250_s15 = inlined_call_operand.vmem [shape: f32[2,4,256], index: 15, kind: output, shape index: {}]  }
   0x1 LB: > { %s4194_s19 = sadd.s32 4294967295, %s4392_s18   ;;  %p4198_p0 = scmp.ge.s32.totalorder %s4392_s18, 1  ;;  %s4392_s18 = sphi %s4484_s18, %s25_s18  }
   0x2   : > { %p447_p1 = scmp.lt.s32.totalorder %s4392_s18, 3 }
   0x4   : > { %p448_p2 = pnand %p4198_p0, %p447_p1 }
   0x5   : > { %p500_p3 = scmp.lt.s32.totalorder (!%p448_p2), %s4194_s19, 1  ;;  %s4395_s24 = smov (!%p448_p2), 17  }
   0x6   : > { %451 = sbr.rel (%p448_p2) target bundleno = 1094 (0x446), region = 80  ;;  %s4396_s25 = smov (!%p448_p2), 16  }
   0x7   : > { %s5261_s26 = smov (!%p448_p2), 15   ;;  %s5259_s27 = smov (!%p448_p2), 1  }
   0x8   : > { %s5253_s28 = smov (!%p448_p2), 127   ;;  %s5251_s29 = smov (!%p448_p2), 113  }
   0x9   : > { %s5255_s30 = smov (!%p448_p2), 112   ;;  %s5257_s16 = smov (!%p448_p2), 111  }
   0xa   : > { %s5264_s17 = smov (!%p448_p2), 113  }
   0xb   : > { %s5270_s19 = smov (!%p500_p3, %s4194_s19), 1  ;;  %v4394_v1 = vmov 0.0   ;;  %v4401_v3 = vmov 0   ;;  %v1448_v4 = vld [vmem:[%s5239_s4] sm:$0xf]  ;;  %v524_v8 = vlaneseq  ;;  %vm572_vm1 = vcmask 1043456  }
   0xc   : > { %s4492_s20 = sshll.u32 %s5270_s19, 3  ;;  %643 = vmatprep.mubr.f32.mxu0 %v4394_v1  ;;  %723 = vmatprep.mubr.f32.mxu1 %v4394_v1  ;;  %v1462_v5 = vld [vmem:[%s5240_s5] sm:$0xf]  ;;  %v4213_v23 = vld [vmem:[%s5237_s2 + $0x4] sm:$0x3]  ;;  %vm568_vm5 = vcmask 31744  }
   0xd   : > { %s509_s23 = scalar_lea.vmem %s5236_s1, %s4492_s20  ;;  %4381 = vset.pattern.permute.xlu0 %v4401_v3  ;;  %4382 = vset.pattern.permute.xlu1 %v4401_v3  ;;  %v1470_v7 = vld [vmem:[%s5241_s6] sm:$0xf]  ;;  %v532_v9 = vshrl.u32 %v524_v8, 7  ;;  %v4572_v10 = vand.u32 127, %v524_v8  ;;  %v4218_v28 = vld [vmem:[%s5237_s2 + $0x6] sm:$0x3] }
   0xe   : > { %v4498_v0 = vld [vmem:[%s509_s23] sm:$0xff]  ;;  %v4227_v42 = vld [vmem:[%s5237_s2 + $0xa] sm:$0x3]  ;;  %v4232_v54 = vld [vmem:[%s5237_s2 + $0xc] sm:$0x3] }
   0xf   : > { %520 = vrot.lane.b32.xlu1 %v4498_v0, %s4395_s24  ;;  %544 = vrot.lane.b32.xlu0 %v4498_v0, %s4396_s25  ;;  %v4507_v2 = vcombine.high %v4498_v0, %v4498_v0  ;;  %v4574_v11 = vsub.s32 0, %v532_v9  ;;  %v4576_v12 = vsub.s32 1, %v532_v9  ;;  %v529_v13 = vld [vmem:[%s5237_s2] sm:$0x3]  ;;  %vm526_vm0 = vcmp.lt.s32.totalorder %v4572_v10, 17 }
  0x10   : > { %v4205_v18 = vld [vmem:[%s5237_s2 + $0x2] sm:$0x3]  ;;  %vm734_vm2 = vcmp.lt.s32.totalorder %v4572_v10, 15  ;;  %vm548_vm3 = vcmp.lt.s32.totalorder %v4572_v10, 16  ;;  %vm840_vm4 = vcmp.lt.s32.totalorder %v4572_v10, 1  ;;  %vm1028_vm6 = vcmp.lt.s32.totalorder %v4572_v10, 127 }
  0x11   : > { %v4583_v16 = vrot.slane %v529_v13, %v4574_v11  ;;  %v4586_v17 = vrot.slane %v529_v13, %v4576_v12  ;;  %v4603_v26 = vrot.slane %v4205_v18, %v4574_v11  ;;  %v4606_v27 = vrot.slane %v4205_v18, %v4576_v12  ;;  %v543_v29 = vld [vmem:[%s5238_s3] sm:$0xf]  ;;  %v4206_v43 = vld [vmem:[%s5238_s3 + $0x4] sm:$0xf]  ;;  %v4214_v55 = vld [vmem:[%s5238_s3 + $0x8] sm:$0xf] }
  0x12   : > { %v4616_v30 = vrot.slane %v4213_v23, %v4574_v11  ;;  %v4619_v31 = vrot.slane %v4213_v23, %v4576_v12  ;;  %v4630_v37 = vrot.slane %v4218_v28, %v4574_v11  ;;  %v4637_v41 = vrot.slane %v4218_v28, %v4576_v12  ;;  %v4219_v56 = vld [vmem:[%s5238_s3 + $0xc] sm:$0xf] }
  0x13   : > { %730 = vrot.lane.b32.xlu0 %v4498_v0, %s5261_s26  ;;  %522 = vrot.lane.b32.xlu1 %v4507_v2, %s4395_s24  ;;  %v4656_v50 = vrot.slane %v4227_v42, %v4574_v11  ;;  %v4664_v53 = vrot.slane %v4227_v42, %v4576_v12  ;;  %v4686_v61 = vrot.slane %v4232_v54, %v4574_v11  ;;  %vm1134_vm7 = vcmp.lt.s32.totalorder %v4572_v10, 113  ;;  %v4237_v3 = vld [vmem:[%s5237_s2 + $0xe] sm:$0x3] }
  0x14   : > { %v4716_v13 = vrot.slane %v4237_v3, %v4574_v11  ;;  %vm1240_vm8 = vcmp.lt.s32.totalorder %v4572_v10, 112  ;;  %v4724_v18 = vrot.slane %v4237_v3, %v4576_v12  ;;  %vm1346_vm9 = vcmp.lt.s32.totalorder %v4572_v10, 111  ;;  %v3953_v10 = vld [vmem:[%s5248_s13] sm:$0xf] }
  0x17   : > { %732 = vrot.lane.b32.xlu1 %v4507_v2, %s5261_s26  ;;  %546 = vrot.lane.b32.xlu0 %v4507_v2, %s4396_s25 }
  0x1b   : > { %838 = vrot.lane.b32.xlu1 %v4507_v2, %s5259_s27  ;;  %836 = vrot.lane.b32.xlu0 %v4498_v0, %s5259_s27 }
  0x1f   : > { %1026 = vrot.lane.b32.xlu1 %v4507_v2, %s5253_s28  ;;  %1024 = vrot.lane.b32.xlu0 %v4498_v0, %s5253_s28  ;;  %s4548_s28 = scalar_lea.vmem %s5235_s0, %s4492_s20 }
  0x20   : > { %v4551_v6 = vld [vmem:[%s4548_s28] sm:$0xff] }
  0x23   : > { %1132 = vrot.lane.b32.xlu1 %v4507_v2, %s5251_s29  ;;  %1130 = vrot.lane.b32.xlu0 %v4498_v0, %s5251_s29  ;;  %s5263_s29 = smov 127  }
  0x27   : > { %1238 = vrot.lane.b32.xlu1 %v4507_v2, %s5255_s30  ;;  %1236 = vrot.lane.b32.xlu0 %v4498_v0, %s5255_s30  ;;  %s5265_s30 = smov 112  }
  0x2b   : > { %1344 = vrot.lane.b32.xlu1 %v4507_v2, %s5257_s16  ;;  %1342 = vrot.lane.b32.xlu0 %v4498_v0, %s5257_s16  ;;  %s5266_s16 = smov 111  }
  0x2f   : > { %1451 = vperm.xlu0 %4381, %v1448_v4   ;;  %1465 = vperm.xlu1 %4382, %v1462_v5   ;;  %v4223_v4 = vld [vmem:[%s5238_s3 + $0x10] sm:$0xf]  ;;  %v4228_v5 = vld [vmem:[%s5238_s3 + $0x14] sm:$0xf] }
  0x33   : > { %1473 = vperm.xlu1 %4382, %v1470_v7   ;;  %1490 = vrot.lane.b32.xlu0 %v4551_v6, %s4396_s25 }
  0x37   : > { %1481 = vrot.lane.b32.xlu0 %v4551_v6, %s4395_s24 }
  0x3b   : > { %1660 = vrot.lane.b32.xlu0 %v4551_v6, %s5261_s26  ;;  %s5267_s26 = smov 15  }
  0x3f   : > { %1752 = vrot.lane.b32.xlu0 %v4551_v6, %s5259_s27  ;;  %s5268_s27 = smov 1  }
  0x43   : > { %1926 = vrot.lane.b32.xlu0 %v4551_v6, %s5263_s29 }
  0x47   : > { %2018 = vrot.lane.b32.xlu0 %v4551_v6, %s5264_s17 }
  0x4b   : > { %2110 = vrot.lane.b32.xlu0 %v4551_v6, %s5265_s30 }
  0x4f   : > { %2202 = vrot.lane.b32.xlu0 %v4551_v6, %s5266_s16 }
  0x81   : > { %v521_v14 = vpop.permute.xlu1 %520  ;;  %v545_v15 = vpop.permute.xlu0 %544 }
  0x85   : > { %v731_v19 = vpop.permute.xlu0 %730  ;;  %v523_v20 = vpop.permute.xlu1 %522 }
  0x86   : > { %v527_v21 = vsel %vm526_vm0, %v521_v14, %v523_v20  ;;  %v528_v22 = vsel %vm526_vm0, %v523_v20, %v521_v14  ;;  %v4242_v20 = vld [vmem:[%s5237_s2 + $0x10] sm:$0x3] }
  0x87   : > { %v541_v24 = vmul.f32 %v4583_v16, %v528_v22  ;;  %v542_v25 = vmul.f32 %v4586_v17, %v527_v21 }
  0x89   : > { %4210 = vmatprep.subr.msk.mxu1 %vm572_vm1, %v542_v25  ;;  %v733_v32 = vpop.permute.xlu1 %732  ;;  %v547_v33 = vpop.permute.xlu0 %546 }
  0x8a   : > { %v735_v34 = vsel %vm734_vm2, %v731_v19, %v733_v32  ;;  %v549_v35 = vsel %vm548_vm3, %v545_v15, %v547_v33  ;;  %v550_v36 = vsel %vm548_vm3, %v547_v33, %v545_v15  ;;  %4211 = vmatpush1.msk.msra.mxu1 %vm572_vm1, %v541_v24  ;;  %v736_v38 = vsel %vm734_vm2, %v733_v32, %v731_v19  ;;  %v4233_v19 = vld [vmem:[%s5238_s3 + $0x18] sm:$0xf]  ;;  %v4238_v33 = vld [vmem:[%s5238_s3 + $0x1c] sm:$0xf] }
  0x8b   : > { %v564_v39 = vmul.f32 %v4603_v26, %v550_v36  ;;  %v565_v40 = vmul.f32 %v4606_v27, %v549_v35  ;;  %4212 = vmatmul.mubr.msk.f32.vlgmr.msra.gmra.mxu1 %vm568_vm5, %v543_v29  ;;  %v751_v44 = vmul.f32 %v4619_v31, %v735_v34  ;;  %v750_v47 = vmul.f32 %v4616_v30, %v736_v38 }
  0x8c   : > { %933 = vmatprep.mubr.f32.mxu1 %v4394_v1  ;;  %v4745_v29 = vrot.slane %v4242_v20, %v4574_v11  ;;  %v4748_v32 = vrot.slane %v4242_v20, %v4576_v12 }
  0x8d   : > { %v839_v45 = vpop.permute.xlu1 %838  ;;  %4207 = vmatprep.subr.msk.mxu0 %vm572_vm1, %v565_v40  ;;  %v837_v46 = vpop.permute.xlu0 %836  ;;  %v4773_v40 = vcombine.high %v4551_v6, %v4551_v6 }
  0x8e   : > { %v841_v48 = vsel %vm840_vm4, %v837_v46, %v839_v45  ;;  %v842_v49 = vsel %vm840_vm4, %v839_v45, %v837_v46  ;;  %4208 = vmatpush1.msk.msra.mxu0 %vm572_vm1, %v564_v39  ;;  %v4243_v39 = vld [vmem:[%s5238_s3 + $0x20] sm:$0xf] }
  0x8f   : > { %v856_v51 = vmul.f32 %v4630_v37, %v842_v49  ;;  %v857_v52 = vmul.f32 %v4637_v41, %v841_v48  ;;  %4209 = vmatmul.mubr.msk.f32.vlgmr.msra.gmra.mxu0 %vm568_vm5, %v4206_v43  ;;  %4215 = vmatprep.subr.msk.mxu0 %vm572_vm1, %v751_v44 }
  0x90   : > { %4216 = vmatpush1.msk.msra.mxu0 %vm572_vm1, %v750_v47  ;;  %827 = vmatprep.mubr.f32.mxu0 %v4394_v1 }
  0x91   : > { %v1027_v57 = vpop.permute.xlu1 %1026  ;;  %4220 = vmatprep.subr.msk.mxu1 %vm572_vm1, %v857_v52  ;;  %v1025_v58 = vpop.permute.xlu0 %1024  ;;  %4224 = vmatprep.subr.msk.mxu0 %vm572_vm1, %v4507_v2  ;;  %v4694_v2 = vrot.slane %v4232_v54, %v4576_v12 }
  0x92   : > { %v1029_v59 = vsel %vm1028_vm6, %v1025_v58, %v1027_v57  ;;  %v1030_v60 = vsel %vm1028_vm6, %v1027_v57, %v1025_v58  ;;  %4221 = vmatpush1.msk.msra.mxu1 %vm572_vm1, %v856_v51  ;;  %1492 = vrot.lane.b32.xlu1 %v4773_v40, %s4396_s25 }
  0x93   : > { %v1044_v62 = vmul.f32 %v4656_v50, %v1029_v59  ;;  %v1045_v63 = vmul.f32 %v4664_v53, %v1030_v60  ;;  %4217 = vmatmul.mubr.msk.f32.vlgmr.msra.gmra.mxu0 %vm568_vm5, %v4214_v55  ;;  %4222 = vmatmul.mubr.msk.f32.vlgmr.msra.gmra.mxu1 %vm568_vm5, %v4219_v56  ;;  %v4247_v56 = vld [vmem:[%s5242_s7 + $0x4] sm:$0xf] }
  0x94   : > { %4225 = vmatpush1.msk.msra.mxu0 %vm572_vm1, %v4498_v0  ;;  %1015 = vmatprep.mubr.f32.mxu0 %v4394_v1 }
  0x95   : > { %v1133_v7 = vpop.permute.xlu1 %1132  ;;  %4229 = vmatprep.subr.msk.mxu1 %vm572_vm1, %v1045_v63  ;;  %v1131_v8 = vpop.permute.xlu0 %1130  ;;  %1121 = vmatprep.mubr.f32.mxu1 %v4394_v1  ;;  %v1489_v63 = vld [vmem:[%s5242_s7] sm:$0xf] }
  0x96   : > { %v1135_v9 = vsel %vm1134_vm7, %v1131_v8, %v1133_v7  ;;  %v1136_v0 = vsel %vm1134_vm7, %v1133_v7, %v1131_v8  ;;  %4230 = vmatpush1.msk.msra.mxu1 %vm572_vm1, %v1044_v62  ;;  %1483 = vrot.lane.b32.xlu1 %v4773_v40, %s4395_s24 }
  0x97   : > { %v1150_v14 = vmul.f32 %v4686_v61, %v1135_v9  ;;  %v1151_v15 = vmul.f32 %v4694_v2, %v1136_v0  ;;  %4226 = vmatmul.mubr.msk.f32.vlgmr.msra.gmra.mxu0 %vm568_vm5, %v4223_v4  ;;  %4231 = vmatmul.mubr.msk.f32.vlgmr.msra.gmra.mxu1 %vm568_vm5, %v4228_v5 }
  0x98   : > { %1227 = vmatprep.mubr.f32.mxu0 %v4394_v1  ;;  %1333 = vmatprep.mubr.f32.mxu1 %v4394_v1 }
  0x99   : > { %v1239_v21 = vpop.permute.xlu1 %1238  ;;  %4234 = vmatprep.subr.msk.mxu0 %vm572_vm1, %v1151_v15  ;;  %v1237_v22 = vpop.permute.xlu0 %1236 }
  0x9a   : > { %v1241_v23 = vsel %vm1240_vm8, %v1237_v22, %v1239_v21  ;;  %v1242_v24 = vsel %vm1240_vm8, %v1239_v21, %v1237_v22  ;;  %4235 = vmatpush1.msk.msra.mxu0 %vm572_vm1, %v1150_v14  ;;  %1662 = vrot.lane.b32.xlu1 %v4773_v40, %s5267_s26  ;;  %v4254_v14 = vld [vmem:[%s5242_s7 + $0x8] sm:$0xf] }
  0x9b   : > { %v1256_v25 = vmul.f32 %v4716_v13, %v1241_v23  ;;  %v1257_v28 = vmul.f32 %v4724_v18, %v1242_v24  ;;  %4236 = vmatmul.mubr.msk.f32.vlgmr.msra.gmra.mxu0 %vm568_vm5, %v4233_v19 }
  0x9c   : > { %1439 = vmatprep.mubr.f32.mxu0 %v4394_v1 }
  0x9d   : > { %v1345_v34 = vpop.permute.xlu1 %1344  ;;  %4239 = vmatprep.subr.msk.mxu1 %vm572_vm1, %v1257_v28  ;;  %v1343_v35 = vpop.permute.xlu0 %1342 }
  0x9e   : > { %v1347_v36 = vsel %vm1346_vm9, %v1343_v35, %v1345_v34  ;;  %v1348_v11 = vsel %vm1346_vm9, %v1345_v34, %v1343_v35  ;;  %4240 = vmatpush1.msk.msra.mxu1 %vm572_vm1, %v1256_v25  ;;  %1754 = vrot.lane.b32.xlu1 %v4773_v40, %s5268_s27  ;;  %v4258_v34 = vld [vmem:[%s5242_s7 + $0xc] sm:$0xf]  ;;  %v4262_v35 = vld [vmem:[%s5242_s7 + $0x10] sm:$0xf] }
  0x9f   : > { %v1362_v12 = vmul.f32 %v4745_v29, %v1347_v36  ;;  %v1363_v38 = vmul.f32 %v4748_v32, %v1348_v11  ;;  %4241 = vmatmul.mubr.msk.f32.vlgmr.msra.gmra.mxu1 %vm568_vm5, %v4238_v33 }
  0xa0   : > { %1573 = vmatprep.mubr.f32.mxu1 %v4394_v1 }
  0xa1   : > { %4244 = vmatprep.subr.msk.mxu0 %vm572_vm1, %v1363_v38 }
  0xa2   : > { %4245 = vmatpush1.msk.msra.mxu0 %vm572_vm1, %v1362_v12  ;;  %1928 = vrot.lane.b32.xlu1 %v4773_v40, %s5263_s29 }
  0xa3   : > { %4246 = vmatmul.mubr.msk.f32.vlgmr.msra.gmra.mxu0 %vm568_vm5, %v4243_v39 }
  0xa4   : > { %1653 = vmatprep.mubr.f32.mxu0 %v4394_v1 }
  0xa6   : > { %2020 = vrot.lane.b32.xlu1 %v4773_v40, %s5264_s17 }
  0xaa   : > { %2112 = vrot.lane.b32.xlu1 %v4773_v40, %s5265_s30  ;;  %v4791_v42 = vpop.permute.xlu0 %1451  ;;  %v4793_v44 = vpop.permute.xlu1 %1465 }
  0xae   : > { %2204 = vrot.lane.b32.xlu1 %v4773_v40, %s5266_s16  ;;  %v1491_v43 = vpop.permute.xlu0 %1490  ;;  %v4795_v46 = vpop.permute.xlu1 %1473 }
  0xb2   : > { %v1482_v45 = vpop.permute.xlu0 %1481 }
  0xb6   : > { %v1661_v47 = vpop.permute.xlu0 %1660 }
  0xba   : > { %v1753_v55 = vpop.permute.xlu0 %1752 }
  0xbe   : > { %v1927_v4 = vpop.permute.xlu0 %1926 }
  0xc2   : > { %v2019_v28 = vpop.permute.xlu0 %2018 }
 0x104   : > { %v1493_v48 = vpop.permute.xlu1 %1492 }
 0x105   : > { %v1494_v49 = vsel %vm548_vm3, %v1491_v43, %v1493_v48  ;;  %v1495_v51 = vsel %vm548_vm3, %v1493_v48, %v1491_v43 }
 0x106   : > { %v1496_v52 = vmul.f32 %v1495_v51, %v4603_v26  ;;  %v1497_v54 = vmul.f32 %v1494_v49, %v4606_v27  ;;  %v4266_v51 = vld [vmem:[%s5242_s7 + $0x14] sm:$0xf] }
 0x108   : > { %4248 = vmatprep.subr.msk.mxu1 %vm572_vm1, %v1497_v54  ;;  %v1484_v57 = vpop.permute.xlu1 %1483 }
 0x109   : > { %v1485_v58 = vsel %vm526_vm0, %v1482_v45, %v1484_v57  ;;  %v1486_v59 = vsel %vm526_vm0, %v1484_v57, %v1482_v45  ;;  %4249 = vmatpush1.msk.msra.mxu1 %vm572_vm1, %v1496_v52 }
 0x10a   : > { %v1487_v60 = vmul.f32 %v1486_v59, %v4583_v16  ;;  %v1488_v62 = vmul.f32 %v1485_v58, %v4586_v17  ;;  %4250 = vmatmul.mubr.msk.f32.vlgmr.msra.gmra.mxu1 %vm568_vm5, %v4247_v56  ;;  %v2111_v56 = vpop.permute.xlu0 %2110 }
 0x10b   : > { %1743 = vmatprep.mubr.f32.mxu1 %v4394_v1 }
 0x10c   : > { %4251 = vmatprep.subr.msk.mxu0 %vm572_vm1, %v1488_v62  ;;  %v1663_v3 = vpop.permute.xlu1 %1662 }
 0x10d   : > { %v1664_v7 = vsel %vm734_vm2, %v1661_v47, %v1663_v3  ;;  %v1665_v8 = vsel %vm734_vm2, %v1663_v3, %v1661_v47  ;;  %4252 = vmatpush1.msk.msra.mxu0 %vm572_vm1, %v1487_v60 }
 0x10e   : > { %v1666_v9 = vmul.f32 %v1665_v8, %v4616_v30  ;;  %v1667_v0 = vmul.f32 %v1664_v7, %v4619_v31  ;;  %4253 = vmatmul.mubr.msk.f32.vlgmr.msra.gmra.mxu0 %vm568_vm5, %v1489_v63 }
 0x10f   : > { %1835 = vmatprep.mubr.f32.mxu0 %v4394_v1 }
 0x110   : > { %4255 = vmatprep.subr.msk.mxu1 %vm572_vm1, %v1667_v0  ;;  %v1755_v15 = vpop.permute.xlu1 %1754 }
 0x111   : > { %v1756_v21 = vsel %vm840_vm4, %v1753_v55, %v1755_v15  ;;  %v1757_v22 = vsel %vm840_vm4, %v1755_v15, %v1753_v55  ;;  %4256 = vmatpush1.msk.msra.mxu1 %vm572_vm1, %v1666_v9 }
 0x112   : > { %v1758_v24 = vmul.f32 %v1757_v22, %v4630_v37  ;;  %v1759_v25 = vmul.f32 %v1756_v21, %v4637_v41  ;;  %4257 = vmatmul.mubr.msk.f32.vlgmr.msra.gmra.mxu1 %vm568_vm5, %v4254_v14  ;;  %4263 = vmatprep.subr.msk.mxu1 %vm572_vm1, %v4773_v40  ;;  %v2203_v22 = vpop.permute.xlu0 %2202 }
 0x113   : > { %4264 = vmatpush1.msk.msra.mxu1 %vm572_vm1, %v4551_v6  ;;  %1917 = vmatprep.mubr.f32.mxu1 %v4394_v1 }
 0x114   : > { %4259 = vmatprep.subr.msk.mxu0 %vm572_vm1, %v1759_v25  ;;  %v1929_v11 = vpop.permute.xlu1 %1928 }
 0x115   : > { %v1930_v39 = vsel %vm1028_vm6, %v1927_v4, %v1929_v11  ;;  %v1931_v43 = vsel %vm1028_vm6, %v1929_v11, %v1927_v4  ;;  %4260 = vmatpush1.msk.msra.mxu0 %vm572_vm1, %v1758_v24 }
 0x116   : > { %v1932_v45 = vmul.f32 %v1930_v39, %v4656_v50  ;;  %v1933_v47 = vmul.f32 %v1931_v43, %v4664_v53  ;;  %4261 = vmatmul.mubr.msk.f32.vlgmr.msra.gmra.mxu0 %vm568_vm5, %v4258_v34  ;;  %4265 = vmatmul.mubr.msk.f32.vlgmr.msra.gmra.mxu1 %vm568_vm5, %v4262_v35 }
 0x117   : > { %2009 = vmatprep.mubr.f32.mxu0 %v4394_v1  ;;  %2101 = vmatprep.mubr.f32.mxu1 %v4394_v1 }
 0x118   : > { %4267 = vmatprep.subr.msk.mxu0 %vm572_vm1, %v1933_v47  ;;  %v2021_v55 = vpop.permute.xlu1 %2020 }
 0x119   : > { %v2022_v59 = vsel %vm1134_vm7, %v2019_v28, %v2021_v55  ;;  %v2023_v60 = vsel %vm1134_vm7, %v2021_v55, %v2019_v28  ;;  %4268 = vmatpush1.msk.msra.mxu0 %vm572_vm1, %v1932_v45 }
 0x11a   : > { %v2024_v3 = vmul.f32 %v2022_v59, %v4686_v61  ;;  %v2025_v4 = vmul.f32 %v2023_v60, %v4694_v2  ;;  %4269 = vmatmul.mubr.msk.f32.vlgmr.msra.gmra.mxu0 %vm568_vm5, %v4266_v51  ;;  %v4278_v59 = vld [vmem:[%s5242_s7 + $0x20] sm:$0xf] }
 0x11b   : > { %2193 = vmatprep.mubr.f32.mxu0 %v4394_v1 }
 0x11c   : > { %4271 = vmatprep.subr.msk.mxu1 %vm572_vm1, %v2025_v4  ;;  %v2113_v9 = vpop.permute.xlu1 %2112 }
 0x11d   : > { %v2114_v15 = vsel %vm1240_vm8, %v2111_v56, %v2113_v9  ;;  %4272 = vmatpush1.msk.msra.mxu1 %vm572_vm1, %v2024_v3 }
 0x120   : > { %v2205_v25 = vpop.permute.xlu1 %2204 }
 0x121   : > { %v2206_v34 = vsel %vm1346_vm9, %v2203_v22, %v2205_v25  ;;  %v2207_v35 = vsel %vm1346_vm9, %v2205_v25, %v2203_v22 }
 0x122   : > { %v2209_v11 = vmul.f32 %v2207_v35, %v4748_v32 }
 0x124   : > { %4279 = vmatprep.subr.msk.mxu1 %vm572_vm1, %v2209_v11 }
 0x14b   : > { %v725_v5 = vpop.f32.mrf.mxu1 }
 0x14d   : > { %v727_v20 = vpop.f32.mrf.mxu1 }
 0x14f   : > { %v645_v19 = vpop.f32.mrf.mxu0 }
 0x150   : > { %v726_v23 = vadd.f32 %v725_v5, %v645_v19  ;;  %v2115_v19 = vsel %vm1240_vm8, %v2113_v9, %v2111_v56 }
 0x151   : > { %v647_v33 = vpop.f32.mrf.mxu0  ;;  %v2117_v21 = vmul.f32 %v2115_v19, %v4724_v18 }
 0x152   : > { %v728_v36 = vadd.f32 %v727_v20, %v647_v33  ;;  %v2116_v20 = vmul.f32 %v2114_v15, %v4716_v13 }
 0x153   : > { %v829_v12 = vpop.f32.mrf.mxu0  ;;  %v935_v38 = vpop.f32.mrf.mxu1  ;;  %4275 = vmatprep.subr.msk.mxu0 %vm572_vm1, %v2117_v21 }
 0x154   : > { %v834_v6 = vadd.f32 %v829_v12, %v726_v23  ;;  %4276 = vmatpush1.msk.msra.mxu0 %vm572_vm1, %v2116_v20 }
 0x155   : > { %v831_v48 = vpop.f32.mrf.mxu0  ;;  %v937_v49 = vpop.f32.mrf.mxu1 }
 0x156   : > { %v835_v52 = vadd.f32 %v831_v48, %v728_v36  ;;  %v940_v54 = vadd.f32 %v935_v38, %v834_v6  ;;  %v2208_v36 = vmul.f32 %v2206_v34, %v4745_v29  ;;  %v4270_v38 = vld [vmem:[%s5242_s7 + $0x18] sm:$0xf] }
 0x157   : > { %v1017_v57 = vpop.f32.mrf.mxu0  ;;  %v1123_v58 = vpop.f32.mrf.mxu1  ;;  %4273 = vmatmul.mubr.msk.f32.vlgmr.msra.gmra.mxu1 %vm568_vm5, %v4270_v38 }
 0x158   : > { %v941_v62 = vadd.f32 %v937_v49, %v835_v52  ;;  %v1022_v63 = vadd.f32 %v1017_v57, %v940_v54  ;;  %4280 = vmatpush1.msk.msra.mxu1 %vm572_vm1, %v2208_v36  ;;  %2285 = vmatprep.mubr.f32.mxu1 %v4394_v1  ;;  %v4274_v52 = vld [vmem:[%s5242_s7 + $0x1c] sm:$0xf]  ;;  %v4289_v36 = vld [vmem:[%s5243_s8 + $0x8] sm:$0xf] }
 0x159   : > { %v1019_v5 = vpop.f32.mrf.mxu0  ;;  %v1125_v0 = vpop.f32.mrf.mxu1  ;;  %4277 = vmatmul.mubr.msk.f32.vlgmr.msra.gmra.mxu0 %vm568_vm5, %v4274_v52 }
 0x15a   : > { %v1023_v7 = vadd.f32 %v1019_v5, %v941_v62  ;;  %v1128_v8 = vadd.f32 %v1123_v58, %v1022_v63  ;;  %2386 = vmatprep.mubr.f32.mxu0 %v4394_v1 }
 0x15b   : > { %v1229_v14 = vpop.f32.mrf.mxu0  ;;  %4281 = vmatmul.mubr.msk.f32.vlgmr.msra.gmra.mxu1 %vm568_vm5, %v4278_v59 }
 0x15c   : > { %v1129_v23 = vadd.f32 %v1125_v0, %v1023_v7  ;;  %v1234_v24 = vadd.f32 %v1229_v14, %v1128_v8  ;;  %2466 = vmatprep.mubr.f32.mxu1 %v4394_v1  ;;  %v4282_v0 = vld [vmem:[%s5243_s8 + $0x4] sm:$0xf] }
 0x15d   : > { %v1231_v28 = vpop.f32.mrf.mxu0 }
 0x15e   : > { %v1235_v39 = vadd.f32 %v1231_v28, %v1129_v23  ;;  %v2302_v23 = vld [vmem:[%s5243_s8] sm:$0xf] }
 0x15f   : > { %v1335_v33 = vpop.f32.mrf.mxu1 }
 0x160   : > { %v1340_v43 = vadd.f32 %v1335_v33, %v1234_v24 }
 0x161   : > { %v1337_v12 = vpop.f32.mrf.mxu1 }
 0x162   : > { %v1341_v45 = vadd.f32 %v1337_v12, %v1235_v39 }
 0x163   : > { %v1441_v6 = vpop.f32.mrf.mxu0 }
 0x164   : > { %v1446_v47 = vadd.f32 %v1441_v6, %v1340_v43 }
 0x165   : > { %v1443_v48 = vpop.f32.mrf.mxu0 }
 0x166   : > { %v1447_v49 = vadd.f32 %v1443_v48, %v1341_v45  ;;  %v1454_v51 = vadd.f32 %v4791_v42, %v1446_v47  ;;  %v4293_v45 = vld [vmem:[%s5243_s8 + $0xc] sm:$0xf]  ;;  %v4297_v47 = vld [vmem:[%s5243_s8 + $0x10] sm:$0xf] }
 0x168   : > { %v1455_v54 = vadd.f32 %v4791_v42, %v1447_v49  ;;  %v1458_v55 = vmul.f32 0.01, %v1454_v51  ;;  %vm1456_vm10 = vcmp.ge.f32.partialorder %v1454_v51, 0.0 }
 0x16a   : > { %v1459_v56 = vmul.f32 0.01, %v1455_v54  ;;  %vm1457_vm11 = vcmp.ge.f32.partialorder %v1455_v54, 0.0  ;;  %v1460_v57 = vsel %vm1456_vm10, %v1454_v51, %v1458_v55 }
 0x16b   : > { %v1468_v58 = vmul.f32 %v4793_v44, %v1460_v57 }
 0x16c   : > { %v1461_v60 = vsel %vm1457_vm11, %v1455_v54, %v1459_v56  ;;  %v4301_v56 = vld [vmem:[%s5243_s8 + $0x14] sm:$0xf] }
 0x16d   : > { %v1469_v42 = vmul.f32 %v4793_v44, %v1461_v60  ;;  %v4914_v62 = vadd.f32 %v4795_v46, %v1468_v58  ;;  %v3111_v44 = vld [vmem:[%s5244_s9] sm:$0xf] }
 0x16f   : > { %v4918_v63 = vadd.f32 %v4795_v46, %v1469_v42  ;;  %2303 = vrot.lane.b32.xlu0 %v4914_v62, %s4396_s25 }
 0x171   : > { %2305 = vrot.lane.b32.xlu1 %v4918_v63, %s4396_s25 }
 0x173   : > { %2294 = vrot.lane.b32.xlu0 %v4914_v62, %s4395_s24 }
 0x175   : > { %2296 = vrot.lane.b32.xlu1 %v4918_v63, %s4395_s24 }
 0x177   : > { %2473 = vrot.lane.b32.xlu0 %v4914_v62, %s5267_s26 }
 0x179   : > { %2475 = vrot.lane.b32.xlu1 %v4918_v63, %s5267_s26 }
 0x17b   : > { %2565 = vrot.lane.b32.xlu0 %v4914_v62, %s5268_s27 }
 0x17d   : > { %2567 = vrot.lane.b32.xlu1 %v4918_v63, %s5268_s27 }
 0x17f   : > { %2741 = vrot.lane.b32.xlu0 %v4914_v62, %s5263_s29 }
 0x181   : > { %2743 = vrot.lane.b32.xlu1 %v4918_v63, %s5263_s29 }
 0x183   : > { %2833 = vrot.lane.b32.xlu0 %v4914_v62, %s5264_s17 }
 0x185   : > { %2835 = vrot.lane.b32.xlu1 %v4918_v63, %s5264_s17 }
 0x187   : > { %2925 = vrot.lane.b32.xlu0 %v4914_v62, %s5265_s30 }
 0x189   : > { %2927 = vrot.lane.b32.xlu1 %v4918_v63, %s5265_s30 }
 0x18b   : > { %3017 = vrot.lane.b32.xlu0 %v4914_v62, %s5266_s16 }
 0x18d   : > { %3019 = vrot.lane.b32.xlu1 %v4918_v63, %s5266_s16 }
 0x18f   : > { %3114 = vperm.xlu0 %4381, %v3111_v44  }
 0x1e1   : > { %v2304_v46 = vpop.permute.xlu0 %2303 }
 0x1e3   : > { %v2306_v3 = vpop.permute.xlu1 %2305 }
 0x1e4   : > { %v2307_v4 = vsel %vm548_vm3, %v2304_v46, %v2306_v3  ;;  %v2308_v5 = vsel %vm548_vm3, %v2306_v3, %v2304_v46  ;;  %v4305_v46 = vld [vmem:[%s5243_s8 + $0x18] sm:$0xf] }
 0x1e5   : > { %v2309_v7 = vmul.f32 %v2308_v5, %v4603_v26  ;;  %v2310_v8 = vmul.f32 %v2307_v4, %v4606_v27  ;;  %v2295_v9 = vpop.permute.xlu0 %2294 }
 0x1e7   : > { %4283 = vmatprep.subr.msk.mxu0 %vm572_vm1, %v2310_v8  ;;  %v2297_v14 = vpop.permute.xlu1 %2296 }
 0x1e8   : > { %v2298_v15 = vsel %vm526_vm0, %v2295_v9, %v2297_v14  ;;  %v2299_v19 = vsel %vm526_vm0, %v2297_v14, %v2295_v9  ;;  %4284 = vmatpush1.msk.msra.mxu0 %vm572_vm1, %v2309_v7  ;;  %v4309_v9 = vld [vmem:[%s5243_s8 + $0x1c] sm:$0xf] }
 0x1e9   : > { %v2300_v20 = vmul.f32 %v2299_v19, %v4583_v16  ;;  %v2301_v21 = vmul.f32 %v2298_v15, %v4586_v17  ;;  %v2474_v22 = vpop.permute.xlu0 %2473  ;;  %4285 = vmatmul.mubr.msk.f32.vlgmr.msra.gmra.mxu0 %vm568_vm5, %v4282_v0 }
 0x1ea   : > { %2556 = vmatprep.mubr.f32.mxu0 %v4394_v1 }
 0x1eb   : > { %4286 = vmatprep.subr.msk.mxu1 %vm572_vm1, %v2301_v21  ;;  %v2476_v24 = vpop.permute.xlu1 %2475 }
 0x1ec   : > { %v2477_v25 = vsel %vm734_vm2, %v2474_v22, %v2476_v24  ;;  %v2478_v28 = vsel %vm734_vm2, %v2476_v24, %v2474_v22  ;;  %4287 = vmatpush1.msk.msra.mxu1 %vm572_vm1, %v2300_v20  ;;  %v4313_v22 = vld [vmem:[%s5243_s8 + $0x20] sm:$0xf] }
 0x1ed   : > { %v2479_v33 = vmul.f32 %v2478_v28, %v4616_v30  ;;  %v2480_v34 = vmul.f32 %v2477_v25, %v4619_v31  ;;  %v2566_v35 = vpop.permute.xlu0 %2565  ;;  %4288 = vmatmul.mubr.msk.f32.vlgmr.msra.gmra.mxu1 %vm568_vm5, %v2302_v23  ;;  %v1575_v23 = vpop.f32.mrf.mxu1 }
 0x1ee   : > { %2648 = vmatprep.mubr.f32.mxu1 %v4394_v1  ;;  %v1655_v25 = vpop.f32.mrf.mxu0 }
 0x1ef   : > { %4290 = vmatprep.subr.msk.mxu0 %vm572_vm1, %v2480_v34  ;;  %v2568_v11 = vpop.permute.xlu1 %2567  ;;  %v1577_v24 = vpop.f32.mrf.mxu1 }
 0x1f0   : > { %v2569_v12 = vsel %vm840_vm4, %v2566_v35, %v2568_v11  ;;  %v2570_v38 = vsel %vm840_vm4, %v2568_v11, %v2566_v35  ;;  %4291 = vmatpush1.msk.msra.mxu0 %vm572_vm1, %v2479_v33  ;;  %v1657_v28 = vpop.f32.mrf.mxu0 }
 0x1f1   : > { %v2571_v39 = vmul.f32 %v2570_v38, %v4630_v37  ;;  %v2572_v43 = vmul.f32 %v2569_v12, %v4637_v41  ;;  %v2742_v6 = vpop.permute.xlu0 %2741  ;;  %4298 = vmatprep.subr.msk.mxu0 %vm572_vm1, %v4918_v63  ;;  %4292 = vmatmul.mubr.msk.f32.vlgmr.msra.gmra.mxu0 %vm568_vm5, %v4289_v36  ;;  %v1745_v33 = vpop.f32.mrf.mxu1 }
 0x1f2   : > { %4299 = vmatpush1.msk.msra.mxu0 %vm572_vm1, %v4914_v62  ;;  %2732 = vmatprep.mubr.f32.mxu0 %v4394_v1  ;;  %v1837_v35 = vpop.f32.mrf.mxu0 }
 0x1f3   : > { %4294 = vmatprep.subr.msk.mxu1 %vm572_vm1, %v2572_v43  ;;  %v2744_v48 = vpop.permute.xlu1 %2743  ;;  %v1747_v34 = vpop.f32.mrf.mxu1 }
 0x1f4   : > { %v2745_v49 = vsel %vm1028_vm6, %v2742_v6, %v2744_v48  ;;  %v2746_v51 = vsel %vm1028_vm6, %v2744_v48, %v2742_v6  ;;  %4295 = vmatpush1.msk.msra.mxu1 %vm572_vm1, %v2571_v39  ;;  %v1839_v36 = vpop.f32.mrf.mxu0 }
 0x1f5   : > { %v2747_v52 = vmul.f32 %v2745_v49, %v4656_v50  ;;  %v2748_v54 = vmul.f32 %v2746_v51, %v4664_v53  ;;  %v2834_v55 = vpop.permute.xlu0 %2833  ;;  %4296 = vmatmul.mubr.msk.f32.vlgmr.msra.gmra.mxu1 %vm568_vm5, %v4293_v45  ;;  %4300 = vmatmul.mubr.msk.f32.vlgmr.msra.gmra.mxu0 %vm568_vm5, %v4297_v47  ;;  %v1919_v11 = vpop.f32.mrf.mxu1 }
 0x1f6   : > { %2824 = vmatprep.mubr.f32.mxu1 %v4394_v1  ;;  %2916 = vmatprep.mubr.f32.mxu0 %v4394_v1  ;;  %v2011_v38 = vpop.f32.mrf.mxu0 }
 0x1f7   : > { %4302 = vmatprep.subr.msk.mxu1 %vm572_vm1, %v2748_v54  ;;  %v2836_v57 = vpop.permute.xlu1 %2835  ;;  %v1921_v12 = vpop.f32.mrf.mxu1  ;;  %v1658_v54 = vadd.f32 %v1657_v28, %v1577_v24 }
 0x1f8   : > { %v2837_v58 = vsel %vm1134_vm7, %v2834_v55, %v2836_v57  ;;  %v2838_v59 = vsel %vm1134_vm7, %v2836_v57, %v2834_v55  ;;  %4303 = vmatpush1.msk.msra.mxu1 %vm572_vm1, %v2747_v52  ;;  %v2013_v39 = vpop.f32.mrf.mxu0  ;;  %v1656_v52 = vadd.f32 %v1655_v25, %v1575_v23 }
 0x1f9   : > { %v2839_v60 = vmul.f32 %v2837_v58, %v4686_v61  ;;  %v2840_v42 = vmul.f32 %v2838_v59, %v4694_v2  ;;  %v2926_v44 = vpop.permute.xlu0 %2925  ;;  %4304 = vmatmul.mubr.msk.f32.vlgmr.msra.gmra.mxu1 %vm568_vm5, %v4301_v56 }
 0x1fa   : > { %3008 = vmatprep.mubr.f32.mxu1 %v4394_v1  ;;  %v1750_v57 = vadd.f32 %v1745_v33, %v1656_v52 }
 0x1fb   : > { %4306 = vmatprep.subr.msk.mxu0 %vm572_vm1, %v2840_v42  ;;  %v2928_v3 = vpop.permute.xlu1 %2927 }
 0x1fc   : > { %v2929_v4 = vsel %vm1240_vm8, %v2926_v44, %v2928_v3  ;;  %v2930_v5 = vsel %vm1240_vm8, %v2928_v3, %v2926_v44  ;;  %4307 = vmatpush1.msk.msra.mxu0 %vm572_vm1, %v2839_v60  ;;  %v1751_v60 = vadd.f32 %v1747_v34, %v1658_v54 }
 0x1fd   : > { %v2931_v7 = vmul.f32 %v2929_v4, %v4716_v13  ;;  %v2932_v8 = vmul.f32 %v2930_v5, %v4724_v18  ;;  %4308 = vmatmul.mubr.msk.f32.vlgmr.msra.gmra.mxu0 %vm568_vm5, %v4305_v46  ;;  %v3018_v0 = vpop.permute.xlu0 %3017  ;;  %v1842_v46 = vadd.f32 %v1837_v35, %v1750_v57 }
 0x1fe   : > { %3100 = vmatprep.mubr.f32.mxu0 %v4394_v1  ;;  %v1843_v5 = vadd.f32 %v1839_v36, %v1751_v60 }
 0x1ff   : > { %4310 = vmatprep.subr.msk.mxu1 %vm572_vm1, %v2932_v8  ;;  %v3020_v14 = vpop.permute.xlu1 %3019 }
 0x200   : > { %v3021_v15 = vsel %vm1346_vm9, %v3018_v0, %v3020_v14  ;;  %v3022_v19 = vsel %vm1346_vm9, %v3020_v14, %v3018_v0  ;;  %4311 = vmatpush1.msk.msra.mxu1 %vm572_vm1, %v2931_v7  ;;  %v1924_v0 = vadd.f32 %v1919_v11, %v1842_v46 }
 0x201   : > { %v3023_v20 = vmul.f32 %v3021_v15, %v4745_v29  ;;  %v3024_v21 = vmul.f32 %v3022_v19, %v4748_v32  ;;  %4312 = vmatmul.mubr.msk.f32.vlgmr.msra.gmra.mxu1 %vm568_vm5, %v4309_v9  ;;  %v1925_v19 = vadd.f32 %v1921_v12, %v1843_v5 }
 0x202   : > { %3221 = vmatprep.mubr.f32.mxu1 %v4394_v1  ;;  %v2016_v24 = vadd.f32 %v2011_v38, %v1924_v0 }
 0x203   : > { %4314 = vmatprep.subr.msk.mxu0 %vm572_vm1, %v3024_v21  ;;  %v2017_v25 = vadd.f32 %v2013_v39, %v1925_v19 }
 0x204   : > { %4315 = vmatpush1.msk.msra.mxu0 %vm572_vm1, %v3023_v20 }
 0x205   : > { %4316 = vmatmul.mubr.msk.f32.vlgmr.msra.gmra.mxu0 %vm568_vm5, %v4313_v22 }
 0x206   : > { %3301 = vmatprep.mubr.f32.mxu0 %v4394_v1 }
 0x20a   : > { %v3115_v5 = vpop.permute.xlu0 %3114 }
 0x217   : > { %v2103_v43 = vpop.f32.mrf.mxu1 }
 0x219   : > { %v2105_v6 = vpop.f32.mrf.mxu1  ;;  %v2195_v45 = vpop.f32.mrf.mxu0 }
 0x21a   : > { %v2109_v52 = vadd.f32 %v2105_v6, %v2017_v25 }
 0x21b   : > { %v2197_v47 = vpop.f32.mrf.mxu0  ;;  %v2287_v48 = vpop.f32.mrf.mxu1 }
 0x21d   : > { %v2289_v49 = vpop.f32.mrf.mxu1 }
 0x2a9   : > { %v2388_v51 = vpop.f32.mrf.mxu0 }
 0x2ab   : > { %v2390_v55 = vpop.f32.mrf.mxu0 }
 0x2ad   : > { %v2468_v56 = vpop.f32.mrf.mxu1 }
 0x2ae   : > { %v2469_v58 = vadd.f32 %v2468_v56, %v2388_v51  ;;  %v2108_v51 = vadd.f32 %v2103_v43, %v2016_v24 }
 0x2af   : > { %v2470_v59 = vpop.f32.mrf.mxu1 }
 0x2b0   : > { %v2471_v42 = vadd.f32 %v2470_v59, %v2390_v55  ;;  %v2200_v11 = vadd.f32 %v2195_v45, %v2108_v51 }
 0x2b1   : > { %v2558_v44 = vpop.f32.mrf.mxu0 }
 0x2b2   : > { %v2563_v3 = vadd.f32 %v2558_v44, %v2469_v58  ;;  %v2201_v58 = vadd.f32 %v2197_v47, %v2109_v52 }
 0x2b3   : > { %v2560_v4 = vpop.f32.mrf.mxu0 }
 0x2b4   : > { %v2564_v7 = vadd.f32 %v2560_v4, %v2471_v42  ;;  %v2292_v42 = vadd.f32 %v2287_v48, %v2200_v11  ;;  %v2293_v46 = vadd.f32 %v2289_v49, %v2201_v58  ;;  %v3944_v49 = vld [vmem:[%s5246_s11] sm:$0xf] }
 0x2b5   : > { %v2650_v8 = vpop.f32.mrf.mxu1  ;;  %v2734_v9 = vpop.f32.mrf.mxu0 }
 0x2b6   : > { %v2655_v14 = vadd.f32 %v2650_v8, %v2563_v3 }
 0x2b7   : > { %v2652_v15 = vpop.f32.mrf.mxu1  ;;  %v2736_v22 = vpop.f32.mrf.mxu0 }
 0x2b8   : > { %v2656_v20 = vadd.f32 %v2652_v15, %v2564_v7  ;;  %v2739_v21 = vadd.f32 %v2734_v9, %v2655_v14 }
 0x2b9   : > { %v2826_v23 = vpop.f32.mrf.mxu1 }
 0x2ba   : > { %v2740_v28 = vadd.f32 %v2736_v22, %v2656_v20  ;;  %v2831_v33 = vadd.f32 %v2826_v23, %v2739_v21  ;;  %v4102_v21 = vld [vmem:[%s5249_s14] sm:$0xf] }
 0x2bb   : > { %v2828_v34 = vpop.f32.mrf.mxu1 }
 0x2bc   : > { %v2832_v36 = vadd.f32 %v2828_v34, %v2740_v28 }
 0x2bd   : > { %v2918_v35 = vpop.f32.mrf.mxu0 }
 0x2be   : > { %v2923_v54 = vadd.f32 %v2918_v35, %v2831_v33  ;;  %v4317_v35 = vld [vmem:[%s5245_s10 + $0x4] sm:$0xf] }
 0x2bf   : > { %v2920_v55 = vpop.f32.mrf.mxu0 }
 0x2c0   : > { %v2924_v12 = vadd.f32 %v2920_v55, %v2832_v36  ;;  %v3137_v55 = vld [vmem:[%s5245_s10] sm:$0xf] }
 0x2c1   : > { %v3010_v56 = vpop.f32.mrf.mxu1 }
 0x2c2   : > { %v3015_v59 = vadd.f32 %v3010_v56, %v2923_v54 }
 0x2c3   : > { %v3012_v57 = vpop.f32.mrf.mxu1 }
 0x2c4   : > { %v3016_v44 = vadd.f32 %v3012_v57, %v2924_v12  ;;  %v4324_v12 = vld [vmem:[%s5245_s10 + $0x8] sm:$0xf] }
 0x2c5   : > { %v3102_v60 = vpop.f32.mrf.mxu0 }
 0x2c6   : > { %v3107_v38 = vadd.f32 %v3102_v60, %v3015_v59 }
 0x2c7   : > { %v3104_v39 = vpop.f32.mrf.mxu0 }
 0x2c8   : > { %v3109_v3 = vadd.f32 %v3107_v38, %v2292_v42  ;;  %v3108_v4 = vadd.f32 %v3104_v39, %v3016_v44  ;;  %v4328_v38 = vld [vmem:[%s5245_s10 + $0xc] sm:$0xf] }
 0x2ca   : > { %v3117_v43 = vadd.f32 %v3115_v5, %v3109_v3  ;;  %v3110_v6 = vadd.f32 %v3108_v4, %v2293_v46 }
 0x2cc   : > { %v3119_v7 = vadd.f32 3.0, %v3117_v43  ;;  %v3118_v8 = vadd.f32 %v3115_v5, %v3110_v6 }
 0x2ce   : > { %v3121_v9 = vmax.f32 %v3119_v7, 0.0  ;;  %v3120_v0 = vadd.f32 3.0, %v3118_v8 }
 0x2d0   : > { %v3123_v45 = vmin.f32 %v3121_v9, 6.0  ;;  %v3122_v14 = vmax.f32 %v3120_v0, 0.0  ;;  %v4340_v0 = vld [vmem:[%s5245_s10 + $0x18] sm:$0xf] }
 0x2d2   : > { %v3125_v47 = vmul.f32 %v3123_v45, %v3117_v43  ;;  %v3124_v15 = vmin.f32 %v3122_v14, 6.0  ;;  %v4336_v43 = vld [vmem:[%s5245_s10 + $0x14] sm:$0xf] }
 0x2d4   : > { %v5068_v19 = vmul.f32 0.16666667, %v3125_v47  ;;  %v3126_v48 = vmul.f32 %v3124_v15, %v3118_v8  ;;  %v4344_v15 = vld [vmem:[%s5245_s10 + $0x1c] sm:$0xf] }
 0x2d6   : > { %v3128_v20 = vmul.f32 0.16666667, %v3126_v48  ;;  %3138 = vrot.lane.b32.xlu1 %v5068_v19, %s4396_s25 }
 0x2d8   : > { %3140 = vrot.lane.b32.xlu0 %v3128_v20, %s4396_s25 }
 0x2da   : > { %3129 = vrot.lane.b32.xlu1 %v5068_v19, %s4395_s24 }
 0x2dc   : > { %3131 = vrot.lane.b32.xlu0 %v3128_v20, %s4395_s24 }
 0x2de   : > { %3308 = vrot.lane.b32.xlu1 %v5068_v19, %s5267_s26 }
 0x2e0   : > { %3310 = vrot.lane.b32.xlu0 %v3128_v20, %s5267_s26  ;;  %s514_s26 = scalar_lea.vmem %s5250_s15, %s4492_s20 }
 0x2e2   : > { %3400 = vrot.lane.b32.xlu1 %v5068_v19, %s5268_s27 }
 0x2e4   : > { %3402 = vrot.lane.b32.xlu0 %v3128_v20, %s5268_s27 }
 0x2e6   : > { %3576 = vrot.lane.b32.xlu1 %v5068_v19, %s5263_s29 }
 0x2e8   : > { %3578 = vrot.lane.b32.xlu0 %v3128_v20, %s5263_s29 }
 0x2ea   : > { %3668 = vrot.lane.b32.xlu1 %v5068_v19, %s5264_s17 }
 0x2ec   : > { %3670 = vrot.lane.b32.xlu0 %v3128_v20, %s5264_s17 }
 0x2ee   : > { %3760 = vrot.lane.b32.xlu1 %v5068_v19, %s5265_s30 }
 0x2f0   : > { %3762 = vrot.lane.b32.xlu0 %v3128_v20, %s5265_s30 }
 0x2f2   : > { %3852 = vrot.lane.b32.xlu1 %v5068_v19, %s5266_s16 }
 0x2f4   : > { %3854 = vrot.lane.b32.xlu0 %v3128_v20, %s5266_s16 }
 0x2f6   : > { %3947 = vperm.xlu1 %4382, %v3944_v49  }
 0x2f8   : > { %4105 = vperm.xlu0 %4381, %v4102_v21   ;;  %v4348_v21 = vld [vmem:[%s5245_s10 + $0x20] sm:$0xf] }
 0x348   : > { %v3139_v22 = vpop.permute.xlu1 %3138 }
 0x34a   : > { %v3141_v23 = vpop.permute.xlu0 %3140 }
 0x34b   : > { %v3142_v24 = vsel %vm548_vm3, %v3139_v22, %v3141_v23  ;;  %v3143_v25 = vsel %vm548_vm3, %v3141_v23, %v3139_v22 }
 0x34c   : > { %v3144_v28 = vmul.f32 %v3143_v25, %v4603_v26  ;;  %v3145_v33 = vmul.f32 %v3142_v24, %v4606_v27  ;;  %v3130_v34 = vpop.permute.xlu1 %3129 }
 0x34e   : > { %4318 = vmatprep.subr.msk.mxu1 %vm572_vm1, %v3145_v33  ;;  %v3132_v51 = vpop.permute.xlu0 %3131 }
 0x34f   : > { %v3133_v52 = vsel %vm526_vm0, %v3130_v34, %v3132_v51  ;;  %v3134_v36 = vsel %vm526_vm0, %v3132_v51, %v3130_v34  ;;  %4319 = vmatpush1.msk.msra.mxu1 %vm572_vm1, %v3144_v28 }
 0x350   : > { %v3135_v26 = vmul.f32 %v3134_v36, %v4583_v16  ;;  %v3136_v27 = vmul.f32 %v3133_v52, %v4586_v17  ;;  %v3309_v54 = vpop.permute.xlu1 %3308  ;;  %4320 = vmatmul.mubr.msk.f32.vlgmr.msra.gmra.mxu1 %vm568_vm5, %v4317_v35 }
 0x351   : > { %3391 = vmatprep.mubr.f32.mxu1 %v4394_v1 }
 0x352   : > { %4321 = vmatprep.subr.msk.mxu0 %vm572_vm1, %v3136_v27  ;;  %v3311_v56 = vpop.permute.xlu0 %3310 }
 0x353   : > { %v3312_v11 = vsel %vm734_vm2, %v3309_v54, %v3311_v56  ;;  %v3313_v16 = vsel %vm734_vm2, %v3311_v56, %v3309_v54  ;;  %4322 = vmatpush1.msk.msra.mxu0 %vm572_vm1, %v3135_v26 }
 0x354   : > { %v3314_v17 = vmul.f32 %v3313_v16, %v4616_v30  ;;  %v3315_v57 = vmul.f32 %v3312_v11, %v4619_v31  ;;  %v3401_v58 = vpop.permute.xlu1 %3400  ;;  %4323 = vmatmul.mubr.msk.f32.vlgmr.msra.gmra.mxu0 %vm568_vm5, %v3137_v55 }
 0x355   : > { %3483 = vmatprep.mubr.f32.mxu0 %v4394_v1 }
 0x356   : > { %4325 = vmatprep.subr.msk.mxu1 %vm572_vm1, %v3315_v57  ;;  %v3403_v59 = vpop.permute.xlu0 %3402 }
 0x357   : > { %v3404_v60 = vsel %vm840_vm4, %v3401_v58, %v3403_v59  ;;  %v3405_v30 = vsel %vm840_vm4, %v3403_v59, %v3401_v58  ;;  %4326 = vmatpush1.msk.msra.mxu1 %vm572_vm1, %v3314_v17 }
 0x358   : > { %v3406_v31 = vmul.f32 %v3405_v30, %v4630_v37  ;;  %v3407_v42 = vmul.f32 %v3404_v60, %v4637_v41  ;;  %v3577_v44 = vpop.permute.xlu1 %3576  ;;  %4333 = vmatprep.subr.msk.mxu1 %vm572_vm1, %v3128_v20  ;;  %4327 = vmatmul.mubr.msk.f32.vlgmr.msra.gmra.mxu1 %vm568_vm5, %v4324_v12  ;;  %v4332_v37 = vld [vmem:[%s5245_s10 + $0x10] sm:$0xf] }
 0x359   : > { %4334 = vmatpush1.msk.msra.mxu1 %vm572_vm1, %v5068_v19  ;;  %3567 = vmatprep.mubr.f32.mxu1 %v4394_v1 }
 0x35a   : > { %4329 = vmatprep.subr.msk.mxu0 %vm572_vm1, %v3407_v42  ;;  %v3579_v41 = vpop.permute.xlu0 %3578 }
 0x35b   : > { %v3580_v39 = vsel %vm1028_vm6, %v3577_v44, %v3579_v41  ;;  %v3581_v46 = vsel %vm1028_vm6, %v3579_v41, %v3577_v44  ;;  %4330 = vmatpush1.msk.msra.mxu0 %vm572_vm1, %v3406_v31 }
 0x35c   : > { %v3582_v3 = vmul.f32 %v3580_v39, %v4656_v50  ;;  %v3583_v4 = vmul.f32 %v3581_v46, %v4664_v53  ;;  %v3669_v5 = vpop.permute.xlu1 %3668  ;;  %4331 = vmatmul.mubr.msk.f32.vlgmr.msra.gmra.mxu0 %vm568_vm5, %v4328_v38  ;;  %4335 = vmatmul.mubr.msk.f32.vlgmr.msra.gmra.mxu1 %vm568_vm5, %v4332_v37 }
 0x35d   : > { %3659 = vmatprep.mubr.f32.mxu0 %v4394_v1  ;;  %3751 = vmatprep.mubr.f32.mxu1 %v4394_v1 }
 0x35e   : > { %4337 = vmatprep.subr.msk.mxu0 %vm572_vm1, %v3583_v4  ;;  %v3671_v6 = vpop.permute.xlu0 %3670 }
 0x35f   : > { %v3672_v50 = vsel %vm1134_vm7, %v3669_v5, %v3671_v6  ;;  %v3673_v53 = vsel %vm1134_vm7, %v3671_v6, %v3669_v5  ;;  %4338 = vmatpush1.msk.msra.mxu0 %vm572_vm1, %v3582_v3 }
 0x360   : > { %v3674_v7 = vmul.f32 %v3672_v50, %v4686_v61  ;;  %v3675_v8 = vmul.f32 %v3673_v53, %v4694_v2  ;;  %v3761_v9 = vpop.permute.xlu1 %3760  ;;  %4339 = vmatmul.mubr.msk.f32.vlgmr.msra.gmra.mxu0 %vm568_vm5, %v4336_v43 }
 0x361   : > { %3843 = vmatprep.mubr.f32.mxu0 %v4394_v1 }
 0x362   : > { %4341 = vmatprep.subr.msk.mxu1 %vm572_vm1, %v3675_v8  ;;  %v3763_v45 = vpop.permute.xlu0 %3762 }
 0x363   : > { %v3764_v14 = vsel %vm1240_vm8, %v3761_v9, %v3763_v45  ;;  %v3765_v61 = vsel %vm1240_vm8, %v3763_v45, %v3761_v9  ;;  %4342 = vmatpush1.msk.msra.mxu1 %vm572_vm1, %v3674_v7 }
 0x364   : > { %v3766_v2 = vmul.f32 %v3764_v14, %v4716_v13  ;;  %v3767_v47 = vmul.f32 %v3765_v61, %v4724_v18  ;;  %4343 = vmatmul.mubr.msk.f32.vlgmr.msra.gmra.mxu1 %vm568_vm5, %v4340_v0  ;;  %v3853_v19 = vpop.permute.xlu1 %3852 }
 0x365   : > { %3935 = vmatprep.mubr.f32.mxu1 %v4394_v1 }
 0x366   : > { %4345 = vmatprep.subr.msk.mxu0 %vm572_vm1, %v3767_v47  ;;  %v3855_v48 = vpop.permute.xlu0 %3854 }
 0x367   : > { %v3856_v20 = vsel %vm1346_vm9, %v3853_v19, %v3855_v48  ;;  %v3857_v13 = vsel %vm1346_vm9, %v3855_v48, %v3853_v19  ;;  %4346 = vmatpush1.msk.msra.mxu0 %vm572_vm1, %v3766_v2 }
 0x368   : > { %v3858_v18 = vmul.f32 %v3856_v20, %v4745_v29  ;;  %v3859_v49 = vmul.f32 %v3857_v13, %v4748_v32  ;;  %4352 = vmatprep.subr.msk.mxu0 %vm572_vm1, %v4918_v63  ;;  %4347 = vmatmul.mubr.msk.f32.vlgmr.msra.gmra.mxu0 %vm568_vm5, %v4344_v15  ;;  %v4385_v29 = vld [vmem:[%s4548_s28] sm:$0xff] }
 0x369   : > { %4353 = vmatpush1.msk.msra.mxu0 %vm572_vm1, %v4914_v62  ;;  %4021 = vmatprep.mubr.f32.mxu0 %v4394_v1  ;;  %v3952_v32 = vld [vmem:[%s5247_s12] sm:$0xf] }
 0x36a   : > { %4349 = vmatprep.subr.msk.mxu1 %vm572_vm1, %v3859_v49 }
 0x36b   : > { %4350 = vmatpush1.msk.msra.mxu1 %vm572_vm1, %v3858_v18 }
 0x36c   : > { %4351 = vmatmul.mubr.msk.f32.vlgmr.msra.gmra.mxu1 %vm568_vm5, %v4348_v21  ;;  %4355 = vmatprep.subr.msk.mxu1 %vm572_vm1, %v4773_v40 }
 0x36d   : > { %4356 = vmatpush1.msk.msra.mxu1 %vm572_vm1, %v4385_v29  ;;  %4095 = vmatprep.mubr.f32.mxu1 %v4394_v1 }
 0x36e   : > { %4354 = vmatmul.mubr.msk.f32.vlgmr.msra.gmra.mxu0 %vm568_vm5, %v3953_v10 }
 0x370   : > { %4357 = vmatmul.mubr.msk.f32.vlgmr.msra.gmra.mxu1 %vm568_vm5, %v3952_v32 }
 0x371   : > { %v3948_v39 = vpop.permute.xlu1 %3947 }
 0x373   : > { %v4106_v46 = vpop.permute.xlu0 %4105 }
 0x410   : > { %v3223_v62 = vpop.f32.mrf.mxu1 }
 0x412   : > { %v3225_v63 = vpop.f32.mrf.mxu1 }
 0x414   : > { %v3303_v22 = vpop.f32.mrf.mxu0 }
 0x415   : > { %v3304_v23 = vadd.f32 %v3303_v22, %v3223_v62 }
 0x416   : > { %v3305_v24 = vpop.f32.mrf.mxu0 }
 0x417   : > { %v3306_v40 = vadd.f32 %v3305_v24, %v3225_v63 }
 0x418   : > { %v3393_v25 = vpop.f32.mrf.mxu1 }
 0x419   : > { %v3398_v28 = vadd.f32 %v3393_v25, %v3304_v23 }
 0x41a   : > { %v3395_v33 = vpop.f32.mrf.mxu1 }
 0x41b   : > { %v3399_v35 = vadd.f32 %v3395_v33, %v3306_v40 }
 0x41c   : > { %v3485_v34 = vpop.f32.mrf.mxu0  ;;  %v3569_v52 = vpop.f32.mrf.mxu1 }
 0x41d   : > { %v3490_v1 = vadd.f32 %v3485_v34, %v3398_v28 }
 0x41e   : > { %v3487_v51 = vpop.f32.mrf.mxu0  ;;  %v3571_v27 = vpop.f32.mrf.mxu1 }
 0x41f   : > { %v3491_v36 = vadd.f32 %v3487_v51, %v3399_v35  ;;  %v3574_v26 = vadd.f32 %v3569_v52, %v3490_v1 }
 0x420   : > { %v3661_v54 = vpop.f32.mrf.mxu0 }
 0x421   : > { %v3575_v55 = vadd.f32 %v3571_v27, %v3491_v36  ;;  %v3666_v56 = vadd.f32 %v3661_v54, %v3574_v26 }
 0x422   : > { %v3663_v11 = vpop.f32.mrf.mxu0 }
 0x423   : > { %v3667_v57 = vadd.f32 %v3663_v11, %v3575_v55 }
 0x424   : > { %v3753_v16 = vpop.f32.mrf.mxu1 }
 0x425   : > { %v3758_v58 = vadd.f32 %v3753_v16, %v3666_v56 }
 0x426   : > { %v3755_v12 = vpop.f32.mrf.mxu1 }
 0x427   : > { %v3759_v30 = vadd.f32 %v3755_v12, %v3667_v57 }
 0x428   : > { %v3845_v17 = vpop.f32.mrf.mxu0 }
 0x429   : > { %v3850_v31 = vadd.f32 %v3845_v17, %v3758_v58 }
 0x42a   : > { %v3847_v59 = vpop.f32.mrf.mxu0 }
 0x42b   : > { %v3851_v38 = vadd.f32 %v3847_v59, %v3759_v30 }
 0x42c   : > { %v3937_v60 = vpop.f32.mrf.mxu1 }
 0x42d   : > { %v3942_v37 = vadd.f32 %v3937_v60, %v3850_v31 }
 0x42e   : > { %v3939_v42 = vpop.f32.mrf.mxu1  ;;  %v4023_v44 = vpop.f32.mrf.mxu0 }
 0x42f   : > { %v3943_v3 = vadd.f32 %v3939_v42, %v3851_v38  ;;  %v3950_v6 = vadd.f32 %v3948_v39, %v3942_v37 }
 0x430   : > { %v4097_v41 = vpop.f32.mrf.mxu1  ;;  %v4025_v5 = vpop.f32.mrf.mxu0 }
 0x431   : > { %v4098_v4 = vadd.f32 %v4097_v41, %v4023_v44  ;;  %v3951_v7 = vadd.f32 %v3948_v39, %v3943_v3 }
 0x432   : > { %v4099_v43 = vpop.f32.mrf.mxu1 }
 0x433   : > { %v4108_v50 = vadd.f32 %v4106_v46, %v4098_v4  ;;  %v4100_v53 = vadd.f32 %v4099_v43, %v4025_v5 }
 0x435   : > { %v4110_v8 = vadd.f32 %v4108_v50, %v3950_v6  ;;  %v4109_v9 = vadd.f32 %v4106_v46, %v4100_v53 }
 0x437   : > { %v4112_v0 = vadd.f32 3.0, %v4110_v8  ;;  %v4111_v45 = vadd.f32 %v4109_v9, %v3951_v7 }
 0x439   : > { %v4114_v14 = vmax.f32 %v4112_v0, 0.0  ;;  %v4113_v61 = vadd.f32 3.0, %v4111_v45 }
 0x43b   : > { %v4116_v2 = vmin.f32 %v4114_v14, 6.0  ;;  %v4115_v47 = vmax.f32 %v4113_v61, 0.0 }
 0x43d   : > { %v4118_v15 = vmul.f32 %v4116_v2, %v4110_v8  ;;  %v4117_v19 = vmin.f32 %v4115_v47, 6.0 }
 0x43f   : > { %v4119_v48 = vmul.f32 %v4117_v19, %v4111_v45  ;;  %v4120_v20 = vmul.f32 0.16666667, %v4118_v15 }
 0x441   : > { %v4121_v13 = vmul.f32 0.16666667, %v4119_v48 }
 0x443   : > { %v4124_v18 = vcombine.low %v4120_v20, %v4121_v13 }
 0x445   : > { %4126 = vst [vmem:[%s514_s26] sm:$0xff] %v4124_v18 }
 0x446 PF: > { %s25_s18 = sadd.s32 1, %s4392_s18  }
 0x447   : > { %p22_p4 = scmp.ge.s32.totalorder %s25_s18, 4  }
 0x449   :  { %24 = sbr.rel (!%p22_p4) target bundleno = 1 (0x1), region = 152 }

</bundles_post_ra>
